<compile_context>
chip_gen: v6e
topology: v6e:2x2x1
jax: 0.10.0
libtpu: 0.0.40
codegen_flags: <defaults>
</compile_context>

<pallas_src>
import numpy as np
import jax
import jax.numpy as jnp
from jax import lax
from jax.experimental import pallas as pl
from jax.experimental.pallas import tpu as pltpu

# ---- static configuration (the "args" of the PyTorch module) ----
B = 2               # batch
C_IN = 4            # args.PMM.in_channels
NUM_CH = 4          # args.num_channels (EEG electrodes = conv2 kernel height)
DIM = 16            # args.dim
SFREQ = 32          # args.sfreq  -> conv1 kernel width = sfreq // 16
KW = SFREQ // 16    # = 2
NON_REL = 16        # args.non_related_period
T_TOTAL = 48        # total time samples of x
T_REL = T_TOTAL - NON_REL      # 32  (related segment length, = T in forward)
T_NR = NON_REL                 # 16  (non-related segment length)
TE_REL = T_REL - KW + 1        # 31  (encoder output length on related segment)
TE_NR = T_NR - KW + 1          # 15  (also: the straddling conv position index, < NON_REL)
GRP = T_TOTAL - KW + 1         # 47  (valid-conv output length of the full, unsplit signal)
ROWS = B * C_IN * NUM_CH       # 32  (rows of the flattened input / contraction size)
BN_EPS = 1e-5
COS_EPS = 1e-6

_HIGHEST = lax.Precision.HIGHEST


def make_interp_matrix(te, t):
    """(te, t) matrix M so that  interp = score @ M  reproduces
    F.interpolate(..., size=(1, t), mode='bilinear', align_corners=False) along time."""
    m = np.zeros((te, t), np.float32)
    scale = te / t
    for j in range(t):
        src = max(scale * (j + 0.5) - 0.5, 0.0)
        i0 = int(src)
        i1 = min(i0 + 1, te - 1)
        w = src - i0
        m[i0, j] += 1.0 - w
        m[i1, j] += w
    return m


def fold_params(w1, b1, s1, sh1, w2, b2, s2, sh2, m):
    """Fold conv1 -> BN1 -> conv2 -> BN2 (all affine in eval mode) into one weight/bias, then
    lay the weight out as KW per-tap blocks, block-diagonal over the batch, so the whole encoder
    (both batches, both taps) is a single matmul against the flattened (ROWS, T_TOTAL) input."""
    # wfull[e, c, k, h] = sum_d s2[e] w2[e,d,h] s1[d] w1[d,c,k]
    wfull = jnp.einsum('e,edh,d,dck->eckh', s2, w2, s1, w1,
                       precision=_HIGHEST)                      # (DIM, C_IN, KW, NUM_CH)
    bfull = s2 * (jnp.einsum('edh,d->e', w2, s1 * b1 + sh1,
                             precision=_HIGHEST) + b2) + sh2    # (DIM,)

    eye_b = jnp.eye(B, dtype=jnp.float32)
    # rows (k, b, d), cols (b, c*NUM_CH + h)  — matches x.reshape(ROWS, T_TOTAL) row order.
    w_enc = jnp.concatenate(
        [jnp.kron(eye_b, wfull[:, :, k, :].reshape(DIM, C_IN * NUM_CH))
         for k in range(KW)], axis=0)                           # (KW*B*DIM, ROWS)
    bias_big = jnp.tile(bfull, (B,)).reshape(B * DIM, 1)        # (B*DIM, 1)

    # 0/1 block-row-sum selectors: rows 0..B-1 sum the (center*emb) blocks per batch,
    # rows B..2B-1 sum the (emb*emb) blocks per batch.
    sel4 = np.zeros((2 * B, 2 * B * DIM), np.float32)
    for b in range(B):
        sel4[b, b * DIM:(b + 1) * DIM] = 1.0
        sel4[B + b, B * DIM + b * DIM:B * DIM + (b + 1) * DIM] = 1.0

    # 0/1 regroup matrix: input rows (b*C_IN + c)*NUM_CH + h  ->  output row h*(B*C_IN) + (b*C_IN+c)
    regroup = np.zeros((ROWS, ROWS), np.float32)
    for h in range(NUM_CH):
        for r in range(B * C_IN):
            regroup[h * (B * C_IN) + r, r * NUM_CH + h] = 1.0

    return (w_enc, bias_big, jnp.asarray(sel4), m, jnp.asarray(regroup))


def pmm_kernel(x_ref, w_ref, b_ref, sel4_ref, m_ref, rg_ref, out_ref, score_ref):
    # x_ref    : (ROWS, T_TOTAL) = (32, 48)   row-major reshape of NCHW x (row = b*16 + c*4 + h)
    # w_ref    : (KW*B*DIM, ROWS) = (64, 32)  per-tap, batch-block-diagonal fused encoder weight
    # b_ref    : (B*DIM, 1)                   fused bias (replicated over batch blocks)
    # sel4_ref : (2*B, 2*B*DIM) = (4, 64)     0/1 block-row-sum selectors
    # m_ref    : (TE_REL, T_REL) = (31, 32)   bilinear-interpolation matrix
    # rg_ref   : (ROWS, ROWS) = (32, 32)      0/1 sublane-regroup matrix for the output slab
    # out_ref  : (B*C_IN, NUM_CH*T_REL) = (8, 128)   lane-dense output slab (one f32 vreg)
    # score_ref: (B, T_REL) = (2, 32)         interpolated temporal score map

    xs = x_ref[...]                                                     # (32, 48)

    # ---- 1) fused encoder: ONE block-diagonal matmul over both batches and all taps;
    #         tap alignment is a static lane slice + add (no im2col, no scratch).
    y = jnp.dot(w_ref[...], xs, precision=_HIGHEST,
                preferred_element_type=jnp.float32)                     # (KW*B*DIM, T_TOTAL)
    z = y[0:B * DIM, 0:GRP]
    for k in range(1, KW):
        z = z + y[k * B * DIM:(k + 1) * B * DIM, k:k + GRP]
    z = z + b_ref[...]                                                  # (B*DIM, GRP) = (32, 47)
    # ELU(alpha=1); Dropout2d is identity in eval mode.
    emb = jnp.where(z > 0, z, jnp.exp(jnp.minimum(z, 0.0)) - 1.0)

    # ---- 2) proxy centers: mean over the TE_NR non-related conv positions,
    #         one lane reduction covering both batches at once.
    centers = jnp.sum(emb[:, 0:TE_NR], axis=1, keepdims=True) * (1.0 / TE_NR)   # (B*DIM, 1)

    # ---- 3) batched cosine terms via ONE block-row-sum matmul (MXU, idle otherwise).
    #         Conv position TE_NR straddles the non-related/related split and is never used,
    #         so we park `centers` in that lane to get ||center||^2 from the same matmul.
    lane = lax.broadcasted_iota(jnp.int32, (B * DIM, GRP), 1)
    emb_aug = jnp.where(lane == TE_NR, centers, emb)                    # (32, 47)
    cat = jnp.concatenate([centers * emb_aug, emb_aug * emb_aug], axis=0)   # (64, 47)
    p = jnp.dot(sel4_ref[...], cat, precision=_HIGHEST,
                preferred_element_type=jnp.float32)                     # (2*B, 47)
    num = p[0:B, NON_REL:NON_REL + TE_REL]                              # (B, TE_REL)
    n1 = jnp.sqrt(jnp.maximum(p[0:B, TE_NR:TE_NR + 1], 0.0))            # (B, 1)
    n2 = jnp.sqrt(jnp.maximum(p[B:2 * B, NON_REL:NON_REL + TE_REL], 0.0))
    cos = num / (jnp.maximum(n1, COS_EPS) * jnp.maximum(n2, COS_EPS))
    score = (1.0 - cos) * 0.5                                           # (B, TE_REL)

    # ---- 4) bilinear resize TE_REL -> T_REL for both batches in one matmul; single store.
    interp = jnp.dot(score, m_ref[...], precision=_HIGHEST,
                     preferred_element_type=jnp.float32)                # (B, T_REL)
    score_ref[...] = interp

    # ---- 5) masked output, assembled fully in registers, ONE dense (8, 128) store.
    #         mult[r, t] = interp[r // (C_IN*NUM_CH), t]  (batch broadcast via iota + select)
    row = lax.broadcasted_iota(jnp.int32, (ROWS, T_REL), 0)
    mult = jnp.broadcast_to(interp[B - 1:B, :], (ROWS, T_REL))
    for b in range(B - 2, -1, -1):
        mult = jnp.where(row < (b + 1) * C_IN * NUM_CH, interp[b:b + 1, :], mult)
    prod = xs[:, NON_REL:] * mult                                       # (32, 32): x_rel * score

    # regroup rows (b*C_IN+c)*NUM_CH + h -> h-major blocks via a 0/1 selection matmul,
    # then one lane concat gives the (B*C_IN, NUM_CH*T_REL) slab (exactly one full vreg).
    rg = jnp.dot(rg_ref[...], prod, precision=_HIGHEST,
                 preferred_element_type=jnp.float32)                    # (32, 32)
    slab = jnp.concatenate(
        [rg[h * (B * C_IN):(h + 1) * (B * C_IN), :] for h in range(NUM_CH)], axis=1)
    out_ref[...] = slab                                                 # (8, 128), unmasked store


def pmm_forward(x, params):
    """x: (B, C_IN, NUM_CH, T_TOTAL) float32 (PyTorch NCHW)."""
    w_enc, bias_big, sel4, m, regroup = params
    x32 = x.reshape(ROWS, T_TOTAL)   # pure row-major reshape (free layout plumbing)

    out_flat, interp = pl.pallas_call(
        pmm_kernel,
        out_shape=(jax.ShapeDtypeStruct((B * C_IN, NUM_CH * T_REL), jnp.float32),
                   jax.ShapeDtypeStruct((B, T_REL), jnp.float32)),
        grid=(1,),  # single step: the whole ~6 KB problem lives in VMEM; no multi-core split.
        in_specs=[
            pl.BlockSpec((ROWS, T_TOTAL), lambda i: (0, 0)),
            pl.BlockSpec((KW * B * DIM, ROWS), lambda i: (0, 0)),
            pl.BlockSpec((B * DIM, 1), lambda i: (0, 0)),
            pl.BlockSpec((2 * B, 2 * B * DIM), lambda i: (0, 0)),
            pl.BlockSpec((TE_REL, T_REL), lambda i: (0, 0)),
            pl.BlockSpec((ROWS, ROWS), lambda i: (0, 0)),
        ],
        out_specs=(pl.BlockSpec((B * C_IN, NUM_CH * T_REL), lambda i: (0, 0)),
                   pl.BlockSpec((B, T_REL), lambda i: (0, 0))),
        compiler_params=pltpu.CompilerParams(dimension_semantics=("arbitrary",)),
    )(x32, w_enc, bias_big, sel4, m, regroup)

    out = out_flat.reshape(B, C_IN, NUM_CH, T_REL)   # pure row-major split
    score = interp.reshape(B, 1, 1, T_REL)
    # PyTorch returns (output, num_channels, interpolated_map, num_channels)
    return out, NUM_CH, score, NUM_CH


# ------------------------- pure-JAX reference (unfused, mirrors the torch module) ------
def _ref_encode(xin, w1, b1, s1, sh1, w2, b2, s2, sh2):
    t_out = xin.shape[-1] - KW + 1
    y1 = b1[None, :, None, None]
    for k in range(KW):
        y1 = y1 + jnp.einsum('dc,bcht->bdht', w1[:, :, k], xin[..., k:k + t_out],
                             precision=_HIGHEST)
    y1 = y1 * s1[None, :, None, None] + sh1[None, :, None, None]
    y2 = jnp.einsum('edh,bdht->bet', w2, y1, precision=_HIGHEST) + b2[None, :, None]
    y2 = y2 * s2[None, :, None] + sh2[None, :, None]
    return jnp.where(y2 > 0, y2, jnp.exp(jnp.minimum(y2, 0.0)) - 1.0)


def _reference(x, w1, b1, s1, sh1, w2, b2, s2, sh2, m):
    rel = x[..., NON_REL:]
    nrel = x[..., :NON_REL]
    e_rel = _ref_encode(rel, w1, b1, s1, sh1, w2, b2, s2, sh2)   # (B, DIM, TE_REL)
    e_nr = _ref_encode(nrel, w1, b1, s1, sh1, w2, b2, s2, sh2)   # (B, DIM, TE_NR)
    center = jnp.mean(e_nr, axis=-1, keepdims=True)              # (B, DIM, 1)
    num = jnp.sum(center * e_rel, axis=1)                        # (B, TE_REL)
    n1 = jnp.sqrt(jnp.sum(center * center, axis=1))              # (B, 1)
    n2 = jnp.sqrt(jnp.sum(e_rel * e_rel, axis=1))                # (B, TE_REL)
    cos = num / (jnp.maximum(n1, COS_EPS) * jnp.maximum(n2, COS_EPS))
    score = (1.0 - cos) * 0.5
    interp = jnp.einsum('be,et->bt', score, m, precision=_HIGHEST)
    interp4 = interp[:, None, None, :]                           # (B, 1, 1, T_REL)
    return rel * interp4, interp4


if __name__ == "__main__":
    key = jax.random.PRNGKey(0)
    ks = jax.random.split(key, 16)

    x = jax.random.normal(ks[0], (B, C_IN, NUM_CH, T_TOTAL), jnp.float32)

    # deterministic synthetic parameters (shapes dictated by the module __init__)
    w1 = 0.1 * jax.random.normal(ks[1], (DIM, C_IN, KW), jnp.float32)     # Conv2d(C_IN->DIM, (1,KW))
    b1 = 0.1 * jax.random.normal(ks[2], (DIM,), jnp.float32)
    g1 = 1.0 + 0.1 * jax.random.normal(ks[3], (DIM,), jnp.float32)        # BN1 gamma
    be1 = 0.1 * jax.random.normal(ks[4], (DIM,), jnp.float32)             # BN1 beta
    rm1 = 0.1 * jax.random.normal(ks[5], (DIM,), jnp.float32)             # BN1 running mean
    rv1 = 1.0 + 0.5 * jax.random.uniform(ks[6], (DIM,), jnp.float32)      # BN1 running var
    w2 = 0.1 * jax.random.normal(ks[7], (DIM, DIM, NUM_CH), jnp.float32)  # Conv2d(DIM->DIM, (NUM_CH,1))
    b2 = 0.1 * jax.random.normal(ks[8], (DIM,), jnp.float32)
    g2 = 1.0 + 0.1 * jax.random.normal(ks[9], (DIM,), jnp.float32)
    be2 = 0.1 * jax.random.normal(ks[10], (DIM,), jnp.float32)
    rm2 = 0.1 * jax.random.normal(ks[11], (DIM,), jnp.float32)
    rv2 = 1.0 + 0.5 * jax.random.uniform(ks[12], (DIM,), jnp.float32)

    # eval-mode BatchNorm folded to per-channel scale / shift
    s1 = g1 / jnp.sqrt(rv1 + BN_EPS)
    sh1 = be1 - rm1 * s1
    s2 = g2 / jnp.sqrt(rv2 + BN_EPS)
    sh2 = be2 - rm2 * s2

    m = jnp.asarray(make_interp_matrix(TE_REL, T_REL))

    # fold conv biases + both BNs + both convs into one matrix / bias (eval mode => exact)
    params = fold_params(w1, b1, s1, sh1, w2, b2, s2, sh2, m)

    fwd = jax.jit(pmm_forward)
    out, _, score_map, _ = fwd(x, params)
    jax.block_until_ready((out, score_map))

    out_ref, score_ref_v = _reference(x, w1, b1, s1, sh1, w2, b2, s2, sh2, m)
    np.testing.assert_allclose(np.asarray(out), np.asarray(out_ref), rtol=1e-3, atol=1e-4)
    np.testing.assert_allclose(np.asarray(score_map), np.asarray(score_ref_v), rtol=1e-3, atol=1e-4)

    print("KERNEL_OK")
</pallas_src>

<mosaic_0001>
module attributes {stable_mosaic.version = 11 : i64} {
  func.func @pmm_kernel(%arg0: i32, %arg1: memref<32x48xf32, #tpu.memory_space<vmem>>, %arg2: memref<64x32xf32, #tpu.memory_space<vmem>>, %arg3: memref<32x1xf32, #tpu.memory_space<vmem>>, %arg4: memref<4x64xf32, #tpu.memory_space<vmem>>, %arg5: memref<31x32xf32, #tpu.memory_space<vmem>>, %arg6: memref<32x32xf32, #tpu.memory_space<vmem>>, %arg7: memref<8x128xf32, #tpu.memory_space<vmem>>, %arg8: memref<2x32xf32, #tpu.memory_space<vmem>>) attributes {dimension_semantics = [#tpu.dimension_semantics<arbitrary>], iteration_bounds = array<i64: 1>, scalar_prefetch = 0 : i64, scratch_operands = 0 : i64, tpu.core_type = #tpu.core_type<tc>, window_params = [{pipeline_mode = #tpu.pipeline_mode<synchronous>, transform_indices = @transform_0, window_bounds = array<i64: 32, 48>}, {pipeline_mode = #tpu.pipeline_mode<synchronous>, transform_indices = @transform_1, window_bounds = array<i64: 64, 32>}, {pipeline_mode = #tpu.pipeline_mode<synchronous>, transform_indices = @transform_2, window_bounds = array<i64: 32, 1>}, {pipeline_mode = #tpu.pipeline_mode<synchronous>, transform_indices = @transform_3, window_bounds = array<i64: 4, 64>}, {pipeline_mode = #tpu.pipeline_mode<synchronous>, transform_indices = @transform_4, window_bounds = array<i64: 31, 32>}, {pipeline_mode = #tpu.pipeline_mode<synchronous>, transform_indices = @transform_5, window_bounds = array<i64: 32, 32>}, {pipeline_mode = #tpu.pipeline_mode<synchronous>, transform_indices = @transform_6, window_bounds = array<i64: 8, 128>}, {pipeline_mode = #tpu.pipeline_mode<synchronous>, transform_indices = @transform_7, window_bounds = array<i64: 2, 32>}]} {
    %c0 = arith.constant 0 : index
    %c0_0 = arith.constant 0 : index
    %0 = vector.load %arg1[%c0, %c0_0] : memref<32x48xf32, #tpu.memory_space<vmem>>, vector<32x48xf32>
    %c0_1 = arith.constant 0 : index
    %c0_2 = arith.constant 0 : index
    %1 = vector.load %arg2[%c0_1, %c0_2] : memref<64x32xf32, #tpu.memory_space<vmem>>, vector<64x32xf32>
    %cst = arith.constant dense<0.000000e+00> : vector<64x48xf32>
    %2 = tpu.matmul %1, %0, %cst {dimension_numbers = #tpu.dot_dimension_numbers<[1], [0], [0], [1], [0, 0, 1, 1], [], []>, precision = #tpu.contract_precision<fp32>} : vector<64x32xf32>, vector<32x48xf32>, vector<64x48xf32> -> vector<64x48xf32>
    %3 = vector.extract_strided_slice %2 {offsets = [0, 0], sizes = [32, 47], strides = [1, 1]} : vector<64x48xf32> to vector<32x47xf32>
    %4 = vector.extract_strided_slice %2 {offsets = [32, 1], sizes = [32, 47], strides = [1, 1]} : vector<64x48xf32> to vector<32x47xf32>
    %5 = arith.addf %3, %4 : vector<32x47xf32>
    %c0_3 = arith.constant 0 : index
    %c0_4 = arith.constant 0 : index
    %6 = vector.load %arg3[%c0_3, %c0_4] : memref<32x1xf32, #tpu.memory_space<vmem>>, vector<32x1xf32>
    %7 = vector.broadcast %6 : vector<32x1xf32> to vector<32x47xf32>
    %8 = arith.addf %5, %7 : vector<32x47xf32>
    %cst_5 = arith.constant 0.000000e+00 : f32
    %9 = vector.broadcast %cst_5 : f32 to vector<32x47xf32>
    %10 = arith.cmpf ogt, %8, %9 : vector<32x47xf32>
    %cst_6 = arith.constant 0.000000e+00 : f32
    %11 = vector.broadcast %cst_6 : f32 to vector<32x47xf32>
    %12 = arith.minimumf %8, %11 : vector<32x47xf32>
    %13 = math.exp %12 : vector<32x47xf32>
    %cst_7 = arith.constant 1.000000e+00 : f32
    %14 = vector.broadcast %cst_7 : f32 to vector<32x47xf32>
    %15 = arith.subf %13, %14 : vector<32x47xf32>
    %16 = arith.select %10, %8, %15 : vector<32x47xi1>, vector<32x47xf32>
    %17 = vector.extract_strided_slice %16 {offsets = [0, 0], sizes = [32, 15], strides = [1, 1]} : vector<32x47xf32> to vector<32x15xf32>
    %cst_8 = arith.constant dense<0.000000e+00> : vector<32xf32>
    %18 = vector.multi_reduction <add>, %17, %cst_8 [1] : vector<32x15xf32> to vector<32xf32>
    %19 = vector.shape_cast %18 : vector<32xf32> to vector<32x1xf32>
    %cst_9 = arith.constant 0.0666666701 : f32
    %20 = vector.broadcast %cst_9 : f32 to vector<32x1xf32>
    %21 = arith.mulf %19, %20 : vector<32x1xf32>
    %22 = tpu.iota {dimensions = array<i32: 1>} : vector<32x47xi32>
    %c15_i32 = arith.constant 15 : i32
    %23 = vector.broadcast %c15_i32 : i32 to vector<32x47xi32>
    %24 = arith.cmpi eq, %22, %23 : vector<32x47xi32>
    %25 = vector.shape_cast %21 : vector<32x1xf32> to vector<32x1xf32>
    %26 = vector.broadcast %25 : vector<32x1xf32> to vector<32x47xf32>
    %27 = arith.select %24, %26, %16 : vector<32x47xi1>, vector<32x47xf32>
    %28 = vector.broadcast %21 : vector<32x1xf32> to vector<32x47xf32>
    %29 = arith.mulf %28, %27 : vector<32x47xf32>
    %30 = arith.mulf %27, %27 : vector<32x47xf32>
    %31 = tpu.concatenate %29, %30 in 0 : vector<32x47xf32>, vector<32x47xf32> -> vector<64x47xf32>
    %c0_10 = arith.constant 0 : index
    %c0_11 = arith.constant 0 : index
    %32 = vector.load %arg4[%c0_10, %c0_11] : memref<4x64xf32, #tpu.memory_space<vmem>>, vector<4x64xf32>
    %cst_12 = arith.constant dense<0.000000e+00> : vector<4x47xf32>
    %33 = tpu.matmul %32, %31, %cst_12 {dimension_numbers = #tpu.dot_dimension_numbers<[1], [0], [0], [1], [0, 0, 1, 1], [], []>, precision = #tpu.contract_precision<fp32>} : vector<4x64xf32>, vector<64x47xf32>, vector<4x47xf32> -> vector<4x47xf32>
    %34 = vector.extract_strided_slice %33 {offsets = [0, 16], sizes = [2, 31], strides = [1, 1]} : vector<4x47xf32> to vector<2x31xf32>
    %35 = vector.extract_strided_slice %33 {offsets = [0, 15], sizes = [2, 1], strides = [1, 1]} : vector<4x47xf32> to vector<2x1xf32>
    %cst_13 = arith.constant 0.000000e+00 : f32
    %36 = vector.broadcast %cst_13 : f32 to vector<2x1xf32>
    %37 = arith.maximumf %35, %36 : vector<2x1xf32>
    %38 = math.sqrt %37 : vector<2x1xf32>
    %39 = vector.extract_strided_slice %33 {offsets = [2, 16], sizes = [2, 31], strides = [1, 1]} : vector<4x47xf32> to vector<2x31xf32>
    %cst_14 = arith.constant 0.000000e+00 : f32
    %40 = vector.broadcast %cst_14 : f32 to vector<2x31xf32>
    %41 = arith.maximumf %39, %40 : vector<2x31xf32>
    %42 = math.sqrt %41 : vector<2x31xf32>
    %cst_15 = arith.constant 9.99999997E-7 : f32
    %43 = vector.broadcast %cst_15 : f32 to vector<2x1xf32>
    %44 = arith.maximumf %38, %43 : vector<2x1xf32>
    %cst_16 = arith.constant 9.99999997E-7 : f32
    %45 = vector.broadcast %cst_16 : f32 to vector<2x31xf32>
    %46 = arith.maximumf %42, %45 : vector<2x31xf32>
    %47 = vector.broadcast %44 : vector<2x1xf32> to vector<2x31xf32>
    %48 = arith.mulf %47, %46 : vector<2x31xf32>
    %49 = arith.divf %34, %48 : vector<2x31xf32>
    %cst_17 = arith.constant 1.000000e+00 : f32
    %50 = vector.broadcast %cst_17 : f32 to vector<2x31xf32>
    %51 = arith.subf %50, %49 : vector<2x31xf32>
    %cst_18 = arith.constant 5.000000e-01 : f32
    %52 = vector.broadcast %cst_18 : f32 to vector<2x31xf32>
    %53 = arith.mulf %51, %52 : vector<2x31xf32>
    %c0_19 = arith.constant 0 : index
    %c0_20 = arith.constant 0 : index
    %54 = vector.load %arg5[%c0_19, %c0_20] : memref<31x32xf32, #tpu.memory_space<vmem>>, vector<31x32xf32>
    %cst_21 = arith.constant dense<0.000000e+00> : vector<2x32xf32>
    %55 = tpu.matmul %53, %54, %cst_21 {dimension_numbers = #tpu.dot_dimension_numbers<[1], [0], [0], [1], [0, 0, 1, 1], [], []>, precision = #tpu.contract_precision<fp32>} : vector<2x31xf32>, vector<31x32xf32>, vector<2x32xf32> -> vector<2x32xf32>
    %c0_22 = arith.constant 0 : index
    %c0_23 = arith.constant 0 : index
    %56 = vector.load %arg8[%c0_22, %c0_23] : memref<2x32xf32, #tpu.memory_space<vmem>>, vector<2x32xf32>
    tpu.vector_store %arg8[%c0_22, %c0_23], %55 {strides = array<i32>} : memref<2x32xf32, #tpu.memory_space<vmem>>, vector<2x32xf32>,
    %57 = tpu.iota {dimensions = array<i32: 0>} : vector<32x32xi32>
    %58 = vector.extract_strided_slice %55 {offsets = [1, 0], sizes = [1, 32], strides = [1, 1]} : vector<2x32xf32> to vector<1x32xf32>
    %59 = vector.shape_cast %58 : vector<1x32xf32> to vector<1x32xf32>
    %60 = vector.broadcast %59 : vector<1x32xf32> to vector<32x32xf32>
    %c16_i32 = arith.constant 16 : i32
    %61 = vector.broadcast %c16_i32 : i32 to vector<32x32xi32>
    %62 = arith.cmpi slt, %57, %61 : vector<32x32xi32>
    %63 = vector.extract_strided_slice %55 {offsets = [0, 0], sizes = [1, 32], strides = [1, 1]} : vector<2x32xf32> to vector<1x32xf32>
    %64 = vector.shape_cast %63 : vector<1x32xf32> to vector<1x32xf32>
    %65 = vector.broadcast %64 : vector<1x32xf32> to vector<32x32xf32>
    %66 = arith.select %62, %65, %60 : vector<32x32xi1>, vector<32x32xf32>
    %67 = vector.extract_strided_slice %0 {offsets = [0, 16], sizes = [32, 32], strides = [1, 1]} : vector<32x48xf32> to vector<32x32xf32>
    %68 = arith.mulf %67, %66 : vector<32x32xf32>
    %c0_24 = arith.constant 0 : index
    %c0_25 = arith.constant 0 : index
    %69 = vector.load %arg6[%c0_24, %c0_25] : memref<32x32xf32, #tpu.memory_space<vmem>>, vector<32x32xf32>
    %cst_26 = arith.constant dense<0.000000e+00> : vector<32x32xf32>
    %70 = tpu.matmul %69, %68, %cst_26 {dimension_numbers = #tpu.dot_dimension_numbers<[1], [0], [0], [1], [0, 0, 1, 1], [], []>, precision = #tpu.contract_precision<fp32>} : vector<32x32xf32>, vector<32x32xf32>, vector<32x32xf32> -> vector<32x32xf32>
    %71 = vector.extract_strided_slice %70 {offsets = [0, 0], sizes = [8, 32], strides = [1, 1]} : vector<32x32xf32> to vector<8x32xf32>
    %72 = vector.extract_strided_slice %70 {offsets = [8, 0], sizes = [8, 32], strides = [1, 1]} : vector<32x32xf32> to vector<8x32xf32>
    %73 = vector.extract_strided_slice %70 {offsets = [16, 0], sizes = [8, 32], strides = [1, 1]} : vector<32x32xf32> to vector<8x32xf32>
    %74 = vector.extract_strided_slice %70 {offsets = [24, 0], sizes = [8, 32], strides = [1, 1]} : vector<32x32xf32> to vector<8x32xf32>
    %75 = tpu.concatenate %71, %72, %73, %74 in 1 : vector<8x32xf32>, vector<8x32xf32>, vector<8x32xf32>, vector<8x32xf32> -> vector<8x128xf32>
    %c0_27 = arith.constant 0 : index
    %c0_28 = arith.constant 0 : index
    %76 = vector.load %arg7[%c0_27, %c0_28] : memref<8x128xf32, #tpu.memory_space<vmem>>, vector<8x128xf32>
    tpu.vector_store %arg7[%c0_27, %c0_28], %75 {strides = array<i32>} : memref<8x128xf32, #tpu.memory_space<vmem>>, vector<8x128xf32>,
    return
  }
  func.func @transform_0(%arg0: i32) -> (i32, i32) {
    %c0_i32 = arith.constant 0 : i32
    %c0_i32_0 = arith.constant 0 : i32
    %c0_i32_1 = arith.constant 0 : i32
    return %c0_i32, %c0_i32_0 : i32, i32
  }
  func.func @transform_1(%arg0: i32) -> (i32, i32) {
    %c0_i32 = arith.constant 0 : i32
    %c0_i32_0 = arith.constant 0 : i32
    %c0_i32_1 = arith.constant 0 : i32
    return %c0_i32, %c0_i32_0 : i32, i32
  }
  func.func @transform_2(%arg0: i32) -> (i32, i32) {
    %c0_i32 = arith.constant 0 : i32
    %c0_i32_0 = arith.constant 0 : i32
    %c0_i32_1 = arith.constant 0 : i32
    return %c0_i32, %c0_i32_0 : i32, i32
  }
  func.func @transform_3(%arg0: i32) -> (i32, i32) {
    %c0_i32 = arith.constant 0 : i32
    %c0_i32_0 = arith.constant 0 : i32
    %c0_i32_1 = arith.constant 0 : i32
    return %c0_i32, %c0_i32_0 : i32, i32
  }
  func.func @transform_4(%arg0: i32) -> (i32, i32) {
    %c0_i32 = arith.constant 0 : i32
    %c0_i32_0 = arith.constant 0 : i32
    %c0_i32_1 = arith.constant 0 : i32
    return %c0_i32, %c0_i32_0 : i32, i32
  }
  func.func @transform_5(%arg0: i32) -> (i32, i32) {
    %c0_i32 = arith.constant 0 : i32
    %c0_i32_0 = arith.constant 0 : i32
    %c0_i32_1 = arith.constant 0 : i32
    return %c0_i32, %c0_i32_0 : i32, i32
  }
  func.func @transform_6(%arg0: i32) -> (i32, i32) {
    %c0_i32 = arith.constant 0 : i32
    %c0_i32_0 = arith.constant 0 : i32
    %c0_i32_1 = arith.constant 0 : i32
    return %c0_i32, %c0_i32_0 : i32, i32
  }
  func.func @transform_7(%arg0: i32) -> (i32, i32) {
    %c0_i32 = arith.constant 0 : i32
    %c0_i32_0 = arith.constant 0 : i32
    %c0_i32_1 = arith.constant 0 : i32
    return %c0_i32, %c0_i32_0 : i32, i32
  }
}

</mosaic_0001>

<bundles_post_ra>
// kernel: pmm_forward.1
= control target key start
LH: loop header
LB: loop body
LE: loop exit
PB: predicated region body
PF: predicated region fallthrough
CT: control target
= control target key end

     0   :  { %vm38_vm0 = vcmask 261120   ;;  %s4137_s0 = inlined_call_operand.vmem [shape: f32[32,48], index: 0, kind: input, shape index: {}]   ;;  %s4138_s1 = inlined_call_operand.vmem [shape: f32[64,32], index: 1, kind: input, shape index: {}]   ;;  %s4139_s2 = inlined_call_operand.vmem [shape: f32[32,1], index: 2, kind: input, shape index: {}]   ;;  %s4140_s3 = inlined_call_operand.vmem [shape: f32[4,64], index: 3, kind: input, shape index: {}]   ;;  %s4141_s4 = inlined_call_operand.vmem [shape: f32[31,32], index: 4, kind: input, shape index: {}]   ;;  %s4142_s5 = inlined_call_operand.vmem [shape: f32[32,32], index: 5, kind: input, shape index: {}]   ;;  %s4143_s6 = inlined_call_operand.vmem [shape: f32[8,128], index: 6, kind: output, shape index: {0}]   ;;  %s4144_s7 = inlined_call_operand.hbm [shape: f32[2,32], index: 7, kind: output, shape index: {1}]  }
   0x1   :  { %v29_v0 = vld [vmem:[%s4137_s0 + $0x18] sm:$0xff]  ;;  %v28_v1 = vld [vmem:[%s4137_s0 + $0x10] sm:$0xff]  ;;  %v27_v2 = vld [vmem:[%s4137_s0 + $0x8] sm:$0xff] }
   0x2   :  { %v3450_v3 = vand.u32 4294901760, %v29_v0  ;;  %v3452_v4 = vand.u32 4294901760, %v28_v1  ;;  %v3454_v5 = vand.u32 4294901760, %v27_v2  ;;  %v26_v6 = vld [vmem:[%s4137_s0] sm:$0xff]  ;;  %v31_v8 = vld [vmem:[%s4138_s1 + $0x8] sm:$0xff]  ;;  %v32_v12 = vld [vmem:[%s4138_s1 + $0x10] sm:$0xff] }
   0x3   :  { %v30_v7 = vld [vmem:[%s4138_s1] sm:$0xff]  ;;  %v3465_v9 = vand.u32 4294901760, %v26_v6  ;;  %v43_v11 = vsel %vm38_vm0, %v31_v8, 0  ;;  %v33_v13 = vld [vmem:[%s4138_s1 + $0x18] sm:$0xff]  ;;  %v46_v19 = vsel %vm38_vm0, %v32_v12, 0 }
   0x4   :  { %v40_v10 = vsel %vm38_vm0, %v30_v7, 0  ;;  %2953 = vmatprep.subr.mxu0 %v3450_v3  ;;  %v3477_v14 = vsub.f32 %v29_v0, %v3450_v3  ;;  %v3481_v16 = vand.u32 4294901760, %v43_v11  ;;  %v3484_v17 = vsub.f32 %v28_v1, %v3452_v4 }
   0x5   :  { %v3479_v15 = vand.u32 4294901760, %v40_v10  ;;  %2954 = vmatpush3.msra.mxu0 %v3450_v3  ;;  %v3488_v18 = vsub.f32 %v27_v2, %v3454_v5  ;;  %v49_v20 = vsel %vm38_vm0, %v33_v13, 0  ;;  %v3493_v21 = vsub.f32 %v26_v6, %v3465_v9 }
   0x6   :  { %13 = vsyncpa [#allocation3], 0  ;;  %2955 = vmatprep.subr.mxu0 %v3452_v4  ;;  %v3497_v22 = vand.u32 4294901760, %v3477_v14  ;;  %v3503_v24 = vsub.f32 %v43_v11, %v3481_v16  ;;  %v3506_v25 = vand.u32 4294901760, %v3484_v17  ;;  %v3513_v27 = vand.u32 4294901760, %v46_v19  ;;  %v34_v38 = vld [vmem:[%s4138_s1 + $0x20] sm:$0xff] }
   0x7   :  { %v3500_v23 = vsub.f32 %v40_v10, %v3479_v15  ;;  %2981 = vmatprep.mubr.f32.mxu1 %v3479_v15  ;;  %2956 = vmatpush3.msra.mxu0 %v3452_v4  ;;  %v3511_v26 = vand.u32 4294901760, %v3488_v18  ;;  %v3515_v28 = vand.u32 4294901760, %v49_v20  ;;  %v3518_v29 = vand.u32 4294901760, %v3493_v21  ;;  %v35_v39 = vld [vmem:[%s4138_s1 + $0x28] sm:$0xff]  ;;  %v36_v47 = vld [vmem:[%s4138_s1 + $0x30] sm:$0xff]  ;;  %v37_v48 = vld [vmem:[%s4138_s1 + $0x38] sm:$0xff] }
   0x8   :  { %2957 = vmatprep.subr.mxu0 %v3454_v5  ;;  %v240_v30 = vsub.f32 %v3477_v14, %v3497_v22  ;;  %v144_v32 = vand.u32 4294901760, %v3503_v24  ;;  %v247_v33 = vsub.f32 %v3484_v17, %v3506_v25  ;;  %v3531_v35 = vsub.f32 %v46_v19, %v3513_v27  ;;  %s3391_s30 = smov 127   ;;  %s3396_s11 = smov 16  }
   0x9   :  { %v134_v31 = vand.u32 4294901760, %v3500_v23  ;;  %2958 = vmatpush3.msra.mxu0 %v3454_v5  ;;  %v254_v34 = vsub.f32 %v3488_v18, %v3511_v26  ;;  %v3534_v36 = vsub.f32 %v49_v20, %v3515_v28  ;;  %v261_v37 = vsub.f32 %v3493_v21, %v3518_v29 }
   0xa   :  { %2959 = vmatprep.subr.mxu0 %v3465_v9  ;;  %v241_v40 = vand.u32 4294901760, %v240_v30  ;;  %v145_v42 = vsub.f32 %v3503_v24, %v144_v32  ;;  %v248_v43 = vand.u32 4294901760, %v247_v33  ;;  %v154_v45 = vand.u32 4294901760, %v3531_v35 }
   0xb   :  { %v135_v41 = vsub.f32 %v3500_v23, %v134_v31  ;;  %2960 = vmatpush3.msra.mxu0 %v3465_v9  ;;  %v255_v44 = vand.u32 4294901760, %v254_v34  ;;  %v164_v46 = vand.u32 4294901760, %v3534_v36  ;;  %v52_v51 = vsel %vm38_vm0, %v34_v38, 0 }
   0xc   :  { %2973 = vmatprep.subr.mxu1 %v241_v40  ;;  %v146_v50 = vand.u32 4294901760, %v145_v42  ;;  %2993 = vmatprep.subr.mxu0 %v3477_v14  ;;  %v55_v52 = vsel %vm38_vm0, %v35_v39, 0  ;;  %v155_v53 = vsub.f32 %v3531_v35, %v154_v45  ;;  %v3569_v55 = vand.u32 4294901760, %v52_v51 }
   0xd   :  { %v136_v49 = vand.u32 4294901760, %v135_v41  ;;  %2974 = vmatpush3.msra.mxu1 %v241_v40  ;;  %v165_v54 = vsub.f32 %v3534_v36, %v164_v46  ;;  %v3571_v56 = vand.u32 4294901760, %v55_v52  ;;  %v262_v57 = vand.u32 4294901760, %v261_v37 }
   0xe   :  { %2975 = vmatprep.subr.mxu1 %v248_v43  ;;  %v58_v58 = vsel %vm38_vm0, %v36_v47, 0  ;;  %v61_v59 = vsel %vm38_vm0, %v37_v48, 0  ;;  %v156_v60 = vand.u32 4294901760, %v155_v53  ;;  %v3576_v62 = vsub.f32 %v52_v51, %v3569_v55 }
   0xf   :  { %2961 = vmatprep.mubr.f32.mxu0 %v136_v49  ;;  %2976 = vmatpush3.msra.mxu1 %v248_v43  ;;  %v166_v61 = vand.u32 4294901760, %v165_v54  ;;  %v3579_v63 = vsub.f32 %v55_v52, %v3571_v56  ;;  %v3582_v0 = vand.u32 4294901760, %v58_v58  ;;  %v3584_v1 = vand.u32 4294901760, %v61_v59 }
  0x10   :  { %2962 = vmatmul.mubr.f32.vlgmr.msra.gmra.mxu0 %v146_v50  ;;  %2977 = vmatprep.subr.mxu1 %v255_v44  ;;  %v174_v2 = vand.u32 4294901760, %v3576_v62  ;;  %vm921_vm1 = vcmask 121856   ;;  %vm3393_vm6 = vmmov 0   ;;  %vm954_vm8 = vcmask 523264  }
  0x11   :  { %2994 = vmatpush3.msra.mxu0 %v3477_v14  ;;  %2964 = vmatprep.mubr.f32.mxu0 %v156_v60  ;;  %v184_v6 = vand.u32 4294901760, %v3579_v63  ;;  %v3590_v7 = vsub.f32 %v58_v58, %v3582_v0  ;;  %v3593_v8 = vsub.f32 %v61_v59, %v3584_v1  ;;  %vm1532_vm11 = vcmask 1046528  }
  0x12   :  { %2978 = vmatpush3.msra.mxu1 %v255_v44  ;;  %2995 = vmatprep.subr.mxu0 %v3484_v17  ;;  %v175_v10 = vsub.f32 %v3576_v62, %v174_v2  ;;  %vm1529_vm12 = vcmask 252928   ;;  %vm2021_vm13 = vcmask 254976  }
  0x13   :  { %2979 = vmatprep.subr.mxu1 %v262_v57  ;;  %v185_v11 = vsub.f32 %v3579_v63, %v184_v6  ;;  %v194_v12 = vand.u32 4294901760, %v3590_v7  ;;  %v204_v13 = vand.u32 4294901760, %v3593_v8  ;;  %2996 = vmatpush3.msra.mxu0 %v3484_v17 }
  0x14   :  { %2965 = vmatmul.mubr.f32.gmra.mxu0 %v166_v61  ;;  %2980 = vmatpush3.msra.mxu1 %v262_v57  ;;  %v176_v14 = vand.u32 4294901760, %v175_v10 }
  0x15   :  { %2982 = vmatmul.mubr.f32.vlgmr.msra.gmra.mxu1 %v3481_v16  ;;  %3013 = vmatprep.subr.mxu1 %v3450_v3  ;;  %v186_v19 = vand.u32 4294901760, %v185_v11  ;;  %v195_v20 = vsub.f32 %v3590_v7, %v194_v12  ;;  %v205_v30 = vsub.f32 %v3593_v8, %v204_v13 }
  0x16   :  { %3014 = vmatpush3.msra.mxu1 %v3450_v3  ;;  %2984 = vmatprep.mubr.f32.mxu1 %v3513_v27 }
  0x17   :  { %3015 = vmatprep.subr.mxu1 %v3452_v4  ;;  %2967 = vmatprep.mubr.f32.mxu0 %v176_v14  ;;  %v196_v33 = vand.u32 4294901760, %v195_v20  ;;  %v206_v34 = vand.u32 4294901760, %v205_v30 }
  0x18   :  { %3016 = vmatpush3.msra.mxu1 %v3452_v4  ;;  %2968 = vmatmul.mubr.f32.gmra.mxu0 %v186_v19 }
  0x19   :  { %2985 = vmatmul.mubr.f32.gmra.mxu1 %v3515_v28  ;;  %2997 = vmatprep.subr.mxu0 %v3488_v18 }
  0x1a   :  { %2987 = vmatprep.mubr.f32.mxu1 %v3569_v55  ;;  %2970 = vmatprep.mubr.f32.mxu0 %v196_v33 }
  0x1b   :  { %2998 = vmatpush3.msra.mxu0 %v3488_v18  ;;  %3017 = vmatprep.subr.mxu1 %v3454_v5 }
  0x1c   :  { %2999 = vmatprep.subr.mxu0 %v3493_v21  ;;  %2971 = vmatmul.mubr.f32.gmra.mxu0 %v206_v34 }
  0x1d   :  { %2988 = vmatmul.mubr.f32.gmra.mxu1 %v3571_v56  ;;  %3000 = vmatpush3.msra.mxu0 %v3493_v21 }
  0x1e   :  { %3001 = vmatprep.mubr.f32.mxu0 %v3500_v23  ;;  %3018 = vmatpush3.msra.mxu1 %v3454_v5 }
  0x1f   :  { %2990 = vmatprep.mubr.f32.mxu1 %v3582_v0  ;;  %3019 = vmatprep.subr.mxu1 %v3465_v9 }
  0x20   :  { %3033 = vmatprep.subr.mxu0 %v3497_v22  ;;  %3002 = vmatmul.mubr.f32.vlgmr.msra.gmra.mxu0 %v3503_v24 }
  0x21   :  { %2991 = vmatmul.mubr.f32.gmra.mxu1 %v3584_v1  ;;  %3004 = vmatprep.mubr.f32.mxu0 %v3531_v35 }
  0x22   :  { %3020 = vmatpush3.msra.mxu1 %v3465_v9  ;;  %3021 = vmatprep.mubr.f32.mxu1 %v134_v31 }
  0x23   :  { %3034 = vmatpush3.msra.mxu0 %v3497_v22  ;;  %3053 = vmatprep.subr.mxu1 %v3450_v3 }
  0x24   :  { %3035 = vmatprep.subr.mxu0 %v3506_v25  ;;  %3005 = vmatmul.mubr.f32.gmra.mxu0 %v3534_v36 }
  0x25   :  { %3022 = vmatmul.mubr.f32.vlgmr.msra.gmra.mxu1 %v144_v32  ;;  %3007 = vmatprep.mubr.f32.mxu0 %v3576_v62 }
  0x26   :  { %3054 = vmatpush3.msra.mxu1 %v3450_v3  ;;  %3024 = vmatprep.mubr.f32.mxu1 %v154_v45  ;;  %v3390_v3 = vmov 0  }
  0x27   :  { %3036 = vmatpush3.msra.mxu0 %v3506_v25  ;;  %3055 = vmatprep.subr.mxu1 %v3452_v4 }
  0x28   :  { %3037 = vmatprep.subr.mxu0 %v3511_v26  ;;  %3008 = vmatmul.mubr.f32.gmra.mxu0 %v3579_v63 }
  0x29   :  { %3025 = vmatmul.mubr.f32.gmra.mxu1 %v164_v46  ;;  %3010 = vmatprep.mubr.f32.mxu0 %v3590_v7 }
  0x2a   :  { %3056 = vmatpush3.msra.mxu1 %v3452_v4  ;;  %3027 = vmatprep.mubr.f32.mxu1 %v174_v2  ;;  %v872_v4 = vld [vmem:[%s4139_s2 + $0x18] sm:$0xff] }
  0x2b   :  { %3038 = vmatpush3.msra.mxu0 %v3511_v26  ;;  %3057 = vmatprep.subr.mxu1 %v3454_v5 }
  0x2c   :  { %3039 = vmatprep.subr.mxu0 %v3518_v29  ;;  %3011 = vmatmul.mubr.f32.gmra.mxu0 %v3593_v8 }
  0x2d   :  { %3028 = vmatmul.mubr.f32.gmra.mxu1 %v184_v6  ;;  %3040 = vmatpush3.msra.mxu0 %v3518_v29 }
  0x2e   :  { %3041 = vmatprep.mubr.f32.mxu0 %v3479_v15  ;;  %3058 = vmatpush3.msra.mxu1 %v3454_v5  ;;  %v870_v5 = vld [vmem:[%s4139_s2 + $0x8] sm:$0xff] }
  0x2f   :  { %3030 = vmatprep.mubr.f32.mxu1 %v194_v12  ;;  %3059 = vmatprep.subr.mxu1 %v3465_v9 }
  0x30   :  { %3042 = vmatmul.mubr.f32.vlgmr.msra.gmra.mxu0 %v3481_v16  ;;  %3060 = vmatpush3.msra.mxu1 %v3465_v9  ;;  %v871_v9 = vld [vmem:[%s4139_s2 + $0x10] sm:$0xff] }
  0x31   :  { %3031 = vmatmul.mubr.f32.gmra.mxu1 %v204_v13  ;;  %3044 = vmatprep.mubr.f32.mxu0 %v3513_v27 }
  0x32   :  { %3061 = vmatprep.mubr.f32.mxu1 %v3479_v15  ;;  %3348 = vset.pattern.permute.xlu0 %v3390_v3 }
  0x33   :  { %3349 = vset.pattern.permute.xlu1 %v3390_v3  ;;  %890 = vperm.xlu0 %3348, %v872_v4  }
  0x34   :  { %3045 = vmatmul.mubr.f32.gmra.mxu0 %v3515_v28  ;;  %880 = vperm.xlu1 %3349, %v870_v5  }
  0x35   :  { %3062 = vmatmul.mubr.f32.vlgmr.msra.gmra.mxu1 %v3481_v16  ;;  %3047 = vmatprep.mubr.f32.mxu0 %v3569_v55 }
  0x36   :  { %3064 = vmatprep.mubr.f32.mxu1 %v3513_v27 }
  0x37   :  { %885 = vperm.xlu0 %3348, %v871_v9  }
  0x38   :  { %3048 = vmatmul.mubr.f32.gmra.mxu0 %v3571_v56 }
  0x39   :  { %3065 = vmatmul.mubr.f32.gmra.mxu1 %v3515_v28  ;;  %3050 = vmatprep.mubr.f32.mxu0 %v3582_v0 }
  0x3a   :  { %3067 = vmatprep.mubr.f32.mxu1 %v3569_v55 }
  0x3c   :  { %3051 = vmatmul.mubr.f32.gmra.mxu0 %v3584_v1 }
  0x3d   :  { %3068 = vmatmul.mubr.f32.gmra.mxu1 %v3571_v56 }
  0x3e   :  { %3070 = vmatprep.mubr.f32.mxu1 %v3582_v0 }
  0x41   :  { %3071 = vmatmul.mubr.f32.gmra.mxu1 %v3584_v1 }
  0xd0   :  { %v2963_v15 = vpop.f32.mrf.mxu0 }
  0xd2   :  { %v138_v16 = vpop.f32.mrf.mxu0 }
  0xd4   :  { %v2966_v17 = vpop.f32.mrf.mxu0 }
  0xd5   :  { %v2983_v18 = vpop.f32.mrf.mxu1 }
  0xd6   :  { %v158_v21 = vpop.f32.mrf.mxu0  ;;  %v306_v22 = vadd.f32 %v2983_v18, %v2963_v15 }
  0xd7   :  { %v299_v23 = vpop.f32.mrf.mxu1 }
  0xd8   :  { %v300_v24 = vadd.f32 %v299_v23, %v138_v16  ;;  %v3682_v25 = vpop.f32.mrf.mxu0 }
  0xd9   :  { %v2986_v26 = vpop.f32.mrf.mxu1 }
  0xda   :  { %v318_v27 = vadd.f32 %v2986_v26, %v2966_v17  ;;  %v3684_v28 = vpop.f32.mrf.mxu0 }
  0xdb   :  { %v311_v29 = vpop.f32.mrf.mxu1 }
  0xdc   :  { %v312_v31 = vadd.f32 %v311_v29, %v158_v21  ;;  %v2972_v32 = vpop.f32.mrf.mxu0 }
  0xdd   :  { %v2989_v35 = vpop.f32.mrf.mxu1 }
  0xde   :  { %v198_v36 = vpop.f32.mrf.mxu0 }
  0xdf   :  { %v323_v37 = vpop.f32.mrf.mxu1 }
  0xe0   :  { %v3003_v38 = vpop.f32.mrf.mxu0 }
  0xe1   :  { %v2992_v39 = vpop.f32.mrf.mxu1  ;;  %v429_v40 = vadd.f32 %v3003_v38, %v306_v22 }
  0xe2   :  { %v421_v41 = vpop.f32.mrf.mxu0  ;;  %v342_v33 = vadd.f32 %v2992_v39, %v2972_v32 }
  0xe3   :  { %v335_v42 = vpop.f32.mrf.mxu1  ;;  %v422_v43 = vadd.f32 %v421_v41, %v300_v24  ;;  %v330_v24 = vadd.f32 %v2989_v35, %v3682_v25 }
  0xe4   :  { %v3006_v44 = vpop.f32.mrf.mxu0  ;;  %v336_v5 = vadd.f32 %v335_v42, %v198_v36 }
  0xe5   :  { %v3023_v45 = vpop.f32.mrf.mxu1  ;;  %v443_v46 = vadd.f32 %v3006_v44, %v318_v27 }
  0xe6   :  { %v556_v47 = vadd.f32 %v3023_v45, %v429_v40  ;;  %v435_v48 = vpop.f32.mrf.mxu0 }
  0xe7   :  { %v547_v49 = vpop.f32.mrf.mxu1  ;;  %v436_v50 = vadd.f32 %v435_v48, %v312_v31  ;;  %v324_v31 = vadd.f32 %v323_v37, %v3684_v28  ;;  %v891_v37 = vpop.permute.xlu0 %890 }
  0xe8   :  { %v548_v51 = vadd.f32 %v547_v49, %v422_v43  ;;  %v3009_v52 = vpop.f32.mrf.mxu0  ;;  %v869_v43 = vld [vmem:[%s4139_s2] sm:$0xff] }
  0xe9   :  { %v3026_v53 = vpop.f32.mrf.mxu1  ;;  %v457_v32 = vadd.f32 %v3009_v52, %v330_v24 }
  0xea   :  { %v572_v54 = vadd.f32 %v3026_v53, %v443_v46  ;;  %v449_v55 = vpop.f32.mrf.mxu0  ;;  %v881_v46 = vpop.permute.xlu1 %880 }
  0xeb   :  { %v563_v56 = vpop.f32.mrf.mxu1  ;;  %v450_v36 = vadd.f32 %v449_v55, %v324_v31 }
  0xec   :  { %v564_v57 = vadd.f32 %v563_v56, %v436_v50  ;;  %v3012_v58 = vpop.f32.mrf.mxu0 }
  0xed   :  { %v3029_v59 = vpop.f32.mrf.mxu1  ;;  %v471_v9 = vadd.f32 %v3012_v58, %v342_v33 }
  0xee   :  { %v463_v60 = vpop.f32.mrf.mxu0  ;;  %v588_v41 = vadd.f32 %v3029_v59, %v457_v32 }
  0xef   :  { %v579_v61 = vpop.f32.mrf.mxu1  ;;  %v464_v18 = vadd.f32 %v463_v60, %v336_v5 }
  0xf0   :  { %v3043_v62 = vpop.f32.mrf.mxu0  ;;  %v580_v44 = vadd.f32 %v579_v61, %v450_v36 }
  0xf1   :  { %v3032_v63 = vpop.f32.mrf.mxu1  ;;  %v693_v0 = vadd.f32 %v3043_v62, %v556_v47  ;;  %v886_v47 = vpop.permute.xlu0 %885 }
  0xf2   :  { %v686_v1 = vpop.f32.mrf.mxu0  ;;  %v604_v21 = vadd.f32 %v3032_v63, %v471_v9 }
  0xf3   :  { %v595_v2 = vpop.f32.mrf.mxu1  ;;  %v687_v6 = vadd.f32 %v686_v1, %v548_v51 }
  0xf4   :  { %v3046_v7 = vpop.f32.mrf.mxu0  ;;  %v596_v26 = vadd.f32 %v595_v2, %v464_v18 }
  0xf5   :  { %v3063_v8 = vpop.f32.mrf.mxu1  ;;  %v705_v10 = vadd.f32 %v3046_v7, %v572_v54 }
  0xf6   :  { %v810_v11 = vadd.f32 %v3063_v8, %v693_v0  ;;  %v698_v12 = vpop.f32.mrf.mxu0 }
  0xf7   :  { %v803_v13 = vpop.f32.mrf.mxu1  ;;  %v699_v14 = vadd.f32 %v698_v12, %v564_v57 }
  0xf8   :  { %v3686_v19 = vadd.f32 %v803_v13, %v687_v6  ;;  %v3049_v20 = vpop.f32.mrf.mxu0 }
  0xf9   :  { %v3066_v30 = vpop.f32.mrf.mxu1  ;;  %v717_v25 = vadd.f32 %v3049_v20, %v588_v41 }
  0xfa   :  { %v822_v34 = vadd.f32 %v3066_v30, %v705_v10  ;;  %v710_v3 = vpop.f32.mrf.mxu0 }
  0xfb   :  { %v815_v4 = vpop.f32.mrf.mxu1  ;;  %v711_v35 = vadd.f32 %v710_v3, %v580_v44 }
  0xfc   :  { %v816_v15 = vadd.f32 %v815_v4, %v699_v14  ;;  %v3052_v16 = vpop.f32.mrf.mxu0 }
  0xfd   :  { %v3069_v17 = vpop.f32.mrf.mxu1  ;;  %v729_v27 = vadd.f32 %v3052_v16, %v604_v21  ;;  %v3392_v16 = vmov 0.0  }
  0xfe   :  { %v722_v22 = vpop.f32.mrf.mxu0  ;;  %v834_v45 = vadd.f32 %v3069_v17, %v717_v25  ;;  %3073 = vmatprep.subr.mxu0 %v3392_v16  ;;  %3092 = vmatprep.subr.mxu1 %v3392_v16  ;;  %v938_v17 = vlaneseq }
  0xff   :  { %v827_v23 = vpop.f32.mrf.mxu1  ;;  %v723_v38 = vadd.f32 %v722_v22, %v596_v26  ;;  %3089 = vmatprep.mubr.msk.f32.mxu0 %vm3393_vm6, %v3392_v16  ;;  %3108 = vmatprep.mubr.msk.f32.mxu1 %vm3393_vm6, %v3392_v16 }
 0x100   :  { %v828_v28 = vadd.f32 %v827_v23, %v711_v35  ;;  %v939_v18 = vand.u32 127, %v938_v17 }
 0x101   :  { %v3072_v29 = vpop.f32.mrf.mxu1 }
 0x102   :  { %v846_v39 = vadd.f32 %v3072_v29, %v729_v27  ;;  %vm940_vm7 = vcmp.eq.s32.totalorder %v939_v18, 15 }
 0x103   :  { %v839_v40 = vpop.f32.mrf.mxu1 }
 0x104   :  { %v840_v42 = vadd.f32 %v839_v40, %v723_v38  ;;  %859 = vrot.lane.b32.xlu1 %v846_v39, %s3391_s30 }
 0x106   :  { %857 = vrot.lane.b32.xlu0 %v840_v42, %s3391_s30  ;;  %v953_v42 = vld [vmem:[%s4140_s3] sm:$0xf]  ;;  %s3395_s3 = smov 112  }
 0x108   :  { %875 = vperm.xlu1 %3349, %v869_v43  }
 0x10a   :  { %855 = vrot.lane.b32.xlu0 %v834_v45, %s3391_s30 }
 0x10c   :  { %853 = vrot.lane.b32.xlu1 %v828_v28, %s3391_s30  ;;  %v956_v28 = vsel %vm954_vm8, %v953_v42, 0 }
 0x176   :  { %v860_v48 = vpop.permute.xlu1 %859 }
 0x177   :  { %v868_v49 = vadd.f32 %v860_v48, %v822_v34 }
 0x178   :  { %v858_v50 = vpop.permute.xlu0 %857 }
 0x179   :  { %v896_v51 = vadd.f32 %v891_v37, %v868_v49  ;;  %v867_v52 = vadd.f32 %v858_v50, %v816_v15 }
 0x17b   :  { %v904_v53 = vmin.f32 %v896_v51, 0.0  ;;  %v895_v54 = vadd.f32 %v886_v47, %v867_v52  ;;  %vm900_vm2 = vcmp.gt.f32.partialorder %v896_v51, 0.0 }
 0x17c   :  { %v856_v55 = vpop.permute.xlu0 %855 }
 0x17d   :  { %v911_v56 = vmul.f32 1.442695, %v904_v53  ;;  %v903_v57 = vmin.f32 %v895_v54, 0.0  ;;  %v866_v58 = vadd.f32 %v856_v55, %v810_v11  ;;  %vm899_vm3 = vcmp.gt.f32.partialorder %v895_v54, 0.0 }
 0x17f   :  { %3352 = vpow2.f32 %v911_v56  ;;  %v909_v59 = vmul.f32 1.442695, %v903_v57  ;;  %v894_v60 = vadd.f32 %v881_v46, %v866_v58 }
 0x181   :  { %3354 = vpow2.f32 %v909_v59  ;;  %v902_v61 = vmin.f32 %v894_v60, 0.0  ;;  %vm898_vm4 = vcmp.gt.f32.partialorder %v894_v60, 0.0 }
 0x183   :  { %v907_v62 = vmul.f32 1.442695, %v902_v61  ;;  %v876_v63 = vpop.permute.xlu1 %875 }
 0x185   :  { %3356 = vpow2.f32 %v907_v62 }
 0x187   :  { %v854_v0 = vpop.permute.xlu1 %853 }
 0x188   :  { %v865_v1 = vadd.f32 %v854_v0, %v3686_v19 }
 0x18a   :  { %v893_v2 = vadd.f32 %v876_v63, %v865_v1 }
 0x18c   :  { %v3353_v6 = vpop.eup %3352  ;;  %v901_v7 = vmin.f32 %v893_v2, 0.0  ;;  %vm897_vm5 = vcmp.gt.f32.partialorder %v893_v2, 0.0 }
 0x18d   :  { %v2748_v8 = vadd.f32 -1.0, %v3353_v6 }
 0x18e   :  { %v3355_v10 = vpop.eup %3354  ;;  %v905_v12 = vmul.f32 1.442695, %v901_v7 }
 0x18f   :  { %v920_v11 = vsel %vm900_vm2, %v896_v51, %v2748_v8  ;;  %v2747_v13 = vadd.f32 -1.0, %v3355_v10  ;;  %v3740_v51 = vand.u32 4294901760, %v956_v28 }
 0x190   :  { %3358 = vpow2.f32 %v905_v12  ;;  %v931_v14 = vsel %vm921_vm1, %v920_v11, 0.0 }
 0x191   :  { %932 = vadd.xlane.f32.xlu0 %v931_v14  ;;  %v919_v20 = vsel %vm899_vm3, %v895_v54, %v2747_v13 }
 0x192   :  { %v3357_v30 = vpop.eup %3356  ;;  %v928_v33 = vsel %vm921_vm1, %v919_v20, 0.0 }
 0x193   :  { %929 = vadd.xlane.f32.xlu1 %v928_v33  ;;  %v2746_v19 = vadd.f32 -1.0, %v3357_v30 }
 0x195   :  { %v918_v34 = vsel %vm898_vm4, %v894_v60, %v2746_v19  ;;  %v3753_v60 = vsub.f32 %v956_v28, %v3740_v51 }
 0x196   :  { %v925_v3 = vsel %vm921_vm1, %v918_v34, 0.0 }
 0x197   :  { %926 = vadd.xlane.f32.xlu0 %v925_v3  ;;  %v1033_v10 = vand.u32 4294901760, %v3753_v60 }
 0x199   :  { %v1034_v33 = vsub.f32 %v3753_v60, %v1033_v10 }
 0x19d   :  { %v3359_v4 = vpop.eup %3358 }
 0x19e   :  { %v2745_v5 = vadd.f32 -1.0, %v3359_v4 }
 0x1a0   :  { %v917_v9 = vsel %vm897_vm5, %v893_v2, %v2745_v5 }
 0x1a1   :  { %v922_v15 = vsel %vm921_vm1, %v917_v9, 0.0 }
 0x1a2   :  { %923 = vadd.xlane.f32.xlu0 %v922_v15 }
 0x21a   :  { %v933_v21 = vpop.xlane.xlu0 %932 }
 0x21b   :  { %v937_v22 = vmul.f32 0.06666667, %v933_v21 }
 0x21c   :  { %v930_v23 = vpop.xlane.xlu1 %929 }
 0x21d   :  { %v944_v24 = vsel %vm940_vm7, %v937_v22, %v920_v11  ;;  %v936_v26 = vmul.f32 0.06666667, %v930_v23 }
 0x21e   :  { %v952_v27 = vmul.f32 %v944_v24, %v944_v24  ;;  %v948_v35 = vmul.f32 %v944_v24, %v937_v22 }
 0x21f   :  { %v943_v29 = vsel %vm940_vm7, %v936_v26, %v919_v20 }
 0x220   :  { %v3707_v31 = vand.u32 4294901760, %v952_v27  ;;  %v951_v32 = vmul.f32 %v943_v29, %v943_v29  ;;  %v927_v38 = vpop.xlane.xlu0 %926  ;;  %v947_v48 = vmul.f32 %v943_v29, %v936_v26  ;;  %v3742_v52 = vand.u32 4294901760, %v948_v35 }
 0x221   :  { %v935_v39 = vmul.f32 0.06666667, %v927_v38 }
 0x222   :  { %v3710_v40 = vsub.f32 %v952_v27, %v3707_v31  ;;  %v3712_v36 = vand.u32 4294901760, %v951_v32  ;;  %3074 = vmatpush3.msra.mxu0 %v3707_v31  ;;  %v3747_v58 = vand.u32 4294901760, %v947_v48  ;;  %v3756_v61 = vsub.f32 %v948_v35, %v3742_v52 }
 0x223   :  { %v942_v41 = vsel %vm940_vm7, %v935_v39, %v918_v34  ;;  %3075 = vmatprep.subr.mxu0 %v3392_v16  ;;  %v3394_v27 = vmov 15  }
 0x224   :  { %v3721_v43 = vsub.f32 %v951_v32, %v3712_v36  ;;  %3076 = vmatpush3.msra.mxu0 %v3712_v36  ;;  %v950_v44 = vmul.f32 %v942_v41, %v942_v41  ;;  %v1060_v25 = vand.u32 4294901760, %v3710_v40  ;;  %v946_v54 = vmul.f32 %v942_v41, %v935_v39  ;;  %3350 = vset.pattern.permute.xlu1 %v3394_v27 }
 0x225   :  { %3077 = vmatprep.subr.mxu0 %v3392_v16  ;;  %v3763_v6 = vsub.f32 %v947_v48, %v3747_v58  ;;  %v1088_v12 = vand.u32 4294901760, %v3756_v61  ;;  %3351 = vset.pattern.permute.xlu0 %v3394_v27 }
 0x226   :  { %v1067_v45 = vand.u32 4294901760, %v3721_v43  ;;  %v3728_v37 = vand.u32 4294901760, %v950_v44  ;;  %v1061_v46 = vsub.f32 %v3710_v40, %v1060_v25  ;;  %v3760_v63 = vand.u32 4294901760, %v946_v54 }
 0x227   :  { %v1095_v14 = vand.u32 4294901760, %v3763_v6  ;;  %v1089_v3 = vsub.f32 %v3756_v61, %v1088_v12 }
 0x228   :  { %v1068_v47 = vsub.f32 %v3721_v43, %v1067_v45  ;;  %v3737_v49 = vsub.f32 %v950_v44, %v3728_v37  ;;  %3078 = vmatpush3.msra.mxu0 %v3728_v37  ;;  %v1062_v50 = vand.u32 4294901760, %v1061_v46  ;;  %v3773_v11 = vsub.f32 %v946_v54, %v3760_v63 }
 0x229   :  { %3079 = vmatprep.subr.mxu0 %v3392_v16  ;;  %v1096_v15 = vsub.f32 %v3763_v6, %v1095_v14  ;;  %v1090_v18 = vand.u32 4294901760, %v1089_v3 }
 0x22a   :  { %v1069_v53 = vand.u32 4294901760, %v1068_v47  ;;  %3093 = vmatpush3.msra.mxu1 %v1062_v50  ;;  %v1074_v56 = vand.u32 4294901760, %v3737_v49  ;;  %v1102_v19 = vand.u32 4294901760, %v3773_v11 }
 0x22b   :  { %v924_v55 = vpop.xlane.xlu0 %923  ;;  %3094 = vmatprep.subr.mxu1 %v3392_v16  ;;  %v1097_v22 = vand.u32 4294901760, %v1096_v15 }
 0x22c   :  { %v934_v57 = vmul.f32 0.06666667, %v924_v55  ;;  %3095 = vmatpush3.msra.mxu1 %v1069_v53  ;;  %v1075_v59 = vsub.f32 %v3737_v49, %v1074_v56  ;;  %v1103_v21 = vsub.f32 %v3773_v11, %v1102_v19 }
 0x22d   :  { %3096 = vmatprep.subr.mxu1 %v3392_v16 }
 0x22e   :  { %v941_v62 = vsel %vm940_vm7, %v934_v57, %v917_v9  ;;  %v1076_v2 = vand.u32 4294901760, %v1075_v59  ;;  %v1035_v9 = vand.u32 4294901760, %v1034_v33  ;;  %v1104_v24 = vand.u32 4294901760, %v1103_v21  ;;  %v1524_v59 = vld [vmem:[%s4141_s4 + $0x10] sm:$0xff]  ;;  %v1522_v33 = vld [vmem:[%s4141_s4] sm:$0xff] }
 0x22f   :  { %v945_v0 = vmul.f32 %v941_v62, %v934_v57  ;;  %v949_v1 = vmul.f32 %v941_v62, %v941_v62  ;;  %v3922_v62 = vand.u32 4294901760, %v1524_v59 }
 0x230   :  { %3097 = vmatpush3.msra.mxu1 %v1076_v2 }
 0x231   :  { %v3765_v7 = vand.u32 4294901760, %v949_v1  ;;  %v3767_v8 = vand.u32 4294901760, %v945_v0  ;;  %3098 = vmatprep.subr.mxu1 %v3392_v16 }
 0x233   :  { %v3776_v13 = vsub.f32 %v949_v1, %v3765_v7  ;;  %3080 = vmatpush3.msra.mxu0 %v3765_v7  ;;  %v3782_v20 = vsub.f32 %v945_v0, %v3767_v8  ;;  %v3927_v1 = vsub.f32 %v1524_v59, %v3922_v62 }
 0x234   :  { %3081 = vmatprep.subr.mxu0 %v3392_v16 }
 0x235   :  { %3082 = vmatpush3.msra.mxu0 %v3742_v52  ;;  %v1081_v30 = vand.u32 4294901760, %v3776_v13  ;;  %v1109_v4 = vand.u32 4294901760, %v3782_v20 }
 0x236   :  { %3083 = vmatprep.subr.mxu0 %v3392_v16 }
 0x237   :  { %3084 = vmatpush3.msra.mxu0 %v3747_v58  ;;  %v1082_v34 = vsub.f32 %v3776_v13, %v1081_v30  ;;  %v1110_v23 = vsub.f32 %v3782_v20, %v1109_v4 }
 0x238   :  { %3085 = vmatprep.subr.mxu0 %v3392_v16 }
 0x239   :  { %3086 = vmatpush3.msra.mxu0 %v3760_v63  ;;  %v1083_v5 = vand.u32 4294901760, %v1082_v34  ;;  %v1111_v26 = vand.u32 4294901760, %v1110_v23 }
 0x23a   :  { %3087 = vmatprep.subr.mxu0 %v3392_v16 }
 0x23b   :  { %3088 = vmatpush3.msra.mxu0 %v3767_v8  ;;  %3099 = vmatpush3.msra.mxu1 %v1083_v5 }
 0x23c   :  { %3100 = vmatprep.subr.mxu1 %v3392_v16  ;;  %3111 = vmatprep.subr.mxu0 %v3392_v16 }
 0x23d   :  { %3090 = vmatmul.mubr.f32.vlgmr.msra.gmra.mxu0 %v1035_v9  ;;  %3101 = vmatpush3.msra.mxu1 %v1090_v18 }
 0x23e   :  { %3112 = vmatpush3.msra.mxu0 %v3710_v40  ;;  %3102 = vmatprep.subr.mxu1 %v3392_v16 }
 0x23f   :  { %3113 = vmatprep.subr.mxu0 %v3392_v16  ;;  %3103 = vmatpush3.msra.mxu1 %v1097_v22 }
 0x240   :  { %3114 = vmatpush3.msra.mxu0 %v3721_v43  ;;  %3104 = vmatprep.subr.mxu1 %v3392_v16 }
 0x241   :  { %3115 = vmatprep.subr.mxu0 %v3392_v16  ;;  %3105 = vmatpush3.msra.mxu1 %v1104_v24 }
 0x242   :  { %3116 = vmatpush3.msra.mxu0 %v3737_v49  ;;  %3106 = vmatprep.subr.mxu1 %v3392_v16 }
 0x243   :  { %3117 = vmatprep.subr.mxu0 %v3392_v16  ;;  %3107 = vmatpush3.msra.mxu1 %v1111_v26 }
 0x244   :  { %3118 = vmatpush3.msra.mxu0 %v3776_v13  ;;  %3109 = vmatmul.mubr.f32.vlgmr.msra.gmra.mxu1 %v3740_v51 }
 0x245   :  { %3119 = vmatprep.subr.mxu0 %v3392_v16  ;;  %3130 = vmatprep.subr.mxu1 %v3392_v16 }
 0x246   :  { %3120 = vmatpush3.msra.mxu0 %v3756_v61  ;;  %3131 = vmatpush3.msra.mxu1 %v3707_v31 }
 0x247   :  { %3121 = vmatprep.subr.mxu0 %v3392_v16  ;;  %3132 = vmatprep.subr.mxu1 %v3392_v16 }
 0x248   :  { %3122 = vmatpush3.msra.mxu0 %v3763_v6  ;;  %3133 = vmatpush3.msra.mxu1 %v3712_v36 }
 0x249   :  { %3123 = vmatprep.subr.mxu0 %v3392_v16  ;;  %3134 = vmatprep.subr.mxu1 %v3392_v16 }
 0x24a   :  { %3124 = vmatpush3.msra.mxu0 %v3773_v11  ;;  %3135 = vmatpush3.msra.mxu1 %v3728_v37 }
 0x24b   :  { %3125 = vmatprep.subr.mxu0 %v3392_v16  ;;  %3136 = vmatprep.subr.mxu1 %v3392_v16 }
 0x24c   :  { %3126 = vmatpush3.msra.mxu0 %v3782_v20  ;;  %3127 = vmatprep.mubr.msk.f32.mxu0 %vm3393_vm6, %v3392_v16 }
 0x24d   :  { %3137 = vmatpush3.msra.mxu1 %v3765_v7  ;;  %3128 = vmatmul.mubr.f32.vlgmr.msra.gmra.mxu0 %v3753_v60  ;;  %v1523_v60 = vld [vmem:[%s4141_s4 + $0x8] sm:$0xff] }
 0x24e   :  { %3138 = vmatprep.subr.mxu1 %v3392_v16  ;;  %3149 = vmatprep.subr.mxu0 %v3392_v16 }
 0x24f   :  { %3139 = vmatpush3.msra.mxu1 %v3742_v52  ;;  %3150 = vmatpush3.msra.mxu0 %v1060_v25 }
 0x250   :  { %3140 = vmatprep.subr.mxu1 %v3392_v16  ;;  %3151 = vmatprep.subr.mxu0 %v3392_v16 }
 0x251   :  { %3141 = vmatpush3.msra.mxu1 %v3747_v58  ;;  %3152 = vmatpush3.msra.mxu0 %v1067_v45 }
 0x252   :  { %3142 = vmatprep.subr.mxu1 %v3392_v16  ;;  %3153 = vmatprep.subr.mxu0 %v3392_v16 }
 0x253   :  { %3143 = vmatpush3.msra.mxu1 %v3760_v63  ;;  %3154 = vmatpush3.msra.mxu0 %v1074_v56 }
 0x254   :  { %3144 = vmatprep.subr.mxu1 %v3392_v16  ;;  %3155 = vmatprep.subr.mxu0 %v3392_v16 }
 0x255   :  { %3145 = vmatpush3.msra.mxu1 %v3767_v8  ;;  %3146 = vmatprep.mubr.msk.f32.mxu1 %vm3393_vm6, %v3392_v16 }
 0x256   :  { %3156 = vmatpush3.msra.mxu0 %v1081_v30  ;;  %3147 = vmatmul.mubr.f32.vlgmr.msra.gmra.mxu1 %v1033_v10 }
 0x257   :  { %3157 = vmatprep.subr.mxu0 %v3392_v16  ;;  %3168 = vmatprep.subr.mxu1 %v3392_v16 }
 0x258   :  { %3158 = vmatpush3.msra.mxu0 %v1088_v12  ;;  %3169 = vmatpush3.msra.mxu1 %v3707_v31 }
 0x259   :  { %3159 = vmatprep.subr.mxu0 %v3392_v16  ;;  %3170 = vmatprep.subr.mxu1 %v3392_v16 }
 0x25a   :  { %3160 = vmatpush3.msra.mxu0 %v1095_v14  ;;  %3171 = vmatpush3.msra.mxu1 %v3712_v36 }
 0x25b   :  { %3161 = vmatprep.subr.mxu0 %v3392_v16  ;;  %3172 = vmatprep.subr.mxu1 %v3392_v16 }
 0x25c   :  { %3162 = vmatpush3.msra.mxu0 %v1102_v19  ;;  %3173 = vmatpush3.msra.mxu1 %v3728_v37  ;;  %v1570_v19 = vand.u32 4294901760, %v1522_v33 }
 0x25d   :  { %3163 = vmatprep.subr.mxu0 %v3392_v16  ;;  %3174 = vmatprep.subr.mxu1 %v3392_v16 }
 0x25e   :  { %3164 = vmatpush3.msra.mxu0 %v1109_v4  ;;  %3165 = vmatprep.mubr.msk.f32.mxu0 %vm3393_vm6, %v3392_v16  ;;  %v1662_v3 = vsub.f32 %v1522_v33, %v1570_v19 }
 0x25f   :  { %3175 = vmatpush3.msra.mxu1 %v3765_v7  ;;  %3166 = vmatmul.mubr.f32.vlgmr.msra.gmra.mxu0 %v3740_v51  ;;  %v1649_v7 = vand.u32 4294901760, %v3927_v1 }
 0x260   :  { %3176 = vmatprep.subr.mxu1 %v3392_v16  ;;  %3184 = vmatprep.mubr.msk.f32.mxu1 %vm3393_vm6, %v3392_v16  ;;  %v1663_v4 = vand.u32 4294901760, %v1662_v3 }
 0x261   :  { %3177 = vmatpush3.msra.mxu1 %v3742_v52  ;;  %3187 = vmatprep.subr.mxu0 %v3392_v16  ;;  %v1650_v12 = vsub.f32 %v3927_v1, %v1649_v7 }
 0x262   :  { %3178 = vmatprep.subr.mxu1 %v3392_v16  ;;  %3195 = vmatprep.mubr.msk.f32.mxu0 %vm3393_vm6, %v3392_v16  ;;  %v1664_v5 = vsub.f32 %v1662_v3, %v1663_v4 }
 0x263   :  { %3179 = vmatpush3.msra.mxu1 %v3747_v58  ;;  %v1525_v58 = vld [vmem:[%s4141_s4 + $0x18] sm:$0x7f]  ;;  %v1651_v20 = vand.u32 4294901760, %v1650_v12 }
 0x264   :  { %3180 = vmatprep.subr.mxu1 %v3392_v16  ;;  %v1534_v61 = vsel %vm1532_vm11, %v1525_v58, 0  ;;  %v1665_v9 = vand.u32 4294901760, %v1664_v5 }
 0x265   :  { %3181 = vmatpush3.msra.mxu1 %v3760_v63  ;;  %v3924_v63 = vand.u32 4294901760, %v1523_v60  ;;  %v1561_v0 = vand.u32 4294901760, %v1534_v61 }
 0x266   :  { %3182 = vmatprep.subr.mxu1 %v3392_v16 }
 0x267   :  { %3183 = vmatpush3.msra.mxu1 %v3767_v8  ;;  %v3930_v2 = vsub.f32 %v1523_v60, %v3924_v63  ;;  %v3932_v6 = vsub.f32 %v1534_v61, %v1561_v0  ;;  %3188 = vmatpush3.msra.mxu0 %v1561_v0 }
 0x268   :  { %3185 = vmatmul.mubr.f32.vlgmr.msra.gmra.mxu1 %v3740_v51  ;;  %3198 = vmatprep.subr.mxu1 %v3392_v16 }
 0x269   :  { %3206 = vmatprep.mubr.msk.f32.mxu1 %vm3393_vm6, %v3392_v16  ;;  %v1656_v8 = vand.u32 4294901760, %v3930_v2  ;;  %3189 = vmatprep.subr.mxu0 %v3392_v16  ;;  %v1642_v10 = vand.u32 4294901760, %v3932_v6 }
 0x26a   :  { %3190 = vmatpush3.msra.mxu0 %v3922_v62 }
 0x26b   :  { %3191 = vmatprep.subr.mxu0 %v3392_v16  ;;  %v1643_v11 = vsub.f32 %v3932_v6, %v1642_v10  ;;  %v1657_v13 = vsub.f32 %v3930_v2, %v1656_v8 }
 0x26c   :  { %3192 = vmatpush3.msra.mxu0 %v3924_v63 }
 0x26d   :  { %3193 = vmatprep.subr.mxu0 %v3392_v16  ;;  %v1644_v14 = vand.u32 4294901760, %v1643_v11  ;;  %v1658_v30 = vand.u32 4294901760, %v1657_v13  ;;  %v2065_v11 = vld [vmem:[%s4142_s5 + $0x8] sm:$0xff]  ;;  %v2066_v13 = vld [vmem:[%s4142_s5 + $0x10] sm:$0xff] }
 0x26e   :  { %3194 = vmatpush3.msra.mxu0 %v1570_v19 }
 0x26f   :  { %3199 = vmatpush3.msra.mxu1 %v1644_v14  ;;  %3209 = vmatprep.subr.mxu0 %v3392_v16  ;;  %v2088_v14 = vsel %vm38_vm0, %v2065_v11, 0 }
 0x270   :  { %3200 = vmatprep.subr.mxu1 %v3392_v16  ;;  %v4042_v33 = vand.u32 4294901760, %v2088_v14 }
 0x271   :  { %3201 = vmatpush3.msra.mxu1 %v1651_v20  ;;  %v2067_v20 = vld [vmem:[%s4142_s5 + $0x18] sm:$0xff] }
 0x272   :  { %3202 = vmatprep.subr.mxu1 %v3392_v16 }
 0x273   :  { %3203 = vmatpush3.msra.mxu1 %v1658_v30  ;;  %v2091_v30 = vsel %vm38_vm0, %v2066_v13, 0 }
 0x274   :  { %3204 = vmatprep.subr.mxu1 %v3392_v16 }
 0x275   :  { %3205 = vmatpush3.msra.mxu1 %v1665_v9 }
 0x276   :  { %3220 = vmatprep.subr.mxu1 %v3392_v16 }
 0x2fd   :  { %v1037_v29 = vpop.f32.mrf.mxu0 }
 0x2ff   :  { %v3091_v31 = vpop.f32.mrf.mxu0 }
 0x304   :  { %v1148_v32 = vpop.f32.mrf.mxu1 }
 0x305   :  { %v1149_v43 = vadd.f32 %v1148_v32, %v1037_v29 }
 0x306   :  { %v3110_v38 = vpop.f32.mrf.mxu1 }
 0x30d   :  { %v1236_v39 = vpop.f32.mrf.mxu0 }
 0x30e   :  { %v1237_v25 = vadd.f32 %v1236_v39, %v1149_v43 }
 0x30f   :  { %v3129_v40 = vpop.f32.mrf.mxu0 }
 0x316   :  { %v1317_v36 = vpop.f32.mrf.mxu1 }
 0x317   :  { %v1318_v35 = vadd.f32 %v1317_v36, %v1237_v25 }
 0x318   :  { %v3148_v41 = vpop.f32.mrf.mxu1 }
 0x31f   :  { %v1412_v42 = vpop.f32.mrf.mxu0 }
 0x320   :  { %v1413_v45 = vadd.f32 %v1412_v42, %v1318_v35 }
 0x321   :  { %v3167_v44 = vpop.f32.mrf.mxu0 }
 0x328   :  { %v1491_v28 = vpop.f32.mrf.mxu1 }
 0x329   :  { %v3908_v37 = vadd.f32 %v1491_v28, %v1413_v45 }
 0x32a   :  { %v3186_v46 = vpop.f32.mrf.mxu1 }
 0x32b   :  { %v1495_v47 = vmax.f32 %v3908_v37, 0.0 }
 0x32d   :  { %3360 = vrsqrt.f32 %v1495_v47  ;;  %vm1498_vm9 = vcmp.eq.f32.partialorder %v1495_v47, inf  ;;  %v1501_v50 = vand.u32 2147483648, %v1495_v47  ;;  %vm1500_vm10 = vcmp.eq.f32.partialorder %v1495_v47, 0.0 }
 0x33a   :  { %v3361_v48 = vpop.eup %3360 }
 0x33b   :  { %v1497_v49 = vmul.f32 %v3361_v48, %v1495_v47 }
 0x33d   :  { %v1499_v51 = vsel %vm1498_vm9, %v1495_v47, %v1497_v49 }
 0x33e   :  { %v1502_v52 = vsel %vm1500_vm10, %v1501_v50, %v1499_v51 }
 0x33f   :  { %v1503_v53 = vmax.f32 %v1502_v52, 1e-06 }
 0x341   :  { %1506 = vperm.xlu1 %3350, %v1503_v53   ;;  %v1509_v54 = vrot.slane %v1503_v53, 2 }
 0x343   :  { %1510 = vrot.lane.b32.xlu0 %v1509_v54, %s3395_s3 }
 0x3b5   :  { %v1511_v55 = vpop.permute.xlu0 %1510 }
 0x3bc   :  { %v1507_v56 = vpop.permute.xlu1 %1506 }
 0x3bd   :  { %v1513_v57 = vmul.f32 %v1511_v55, %v1507_v56 }
 0x3bf   :  { %1515 = vrot.lane.b32.xlu1 %v1513_v57, %s3396_s11 }
 0x431   :  { %v1516_v34 = vpop.permute.xlu1 %1515 }
 0x432   :  { %3362 = vrcp.f32 %v1516_v34  ;;  %v4045_v34 = vand.u32 4294901760, %v2091_v30 }
 0x434   :  { %v4053_v5 = vsub.f32 %v2091_v30, %v4045_v34 }
 0x43f   :  { %v3363_v15 = vpop.eup %3362 }
 0x440   :  { %v1519_v18 = vmul.f32 %v3363_v15, %v3908_v37  ;;  %v2029_v37 = vshrl.u32 %v938_v17, 7  ;;  %v2064_v17 = vld [vmem:[%s4142_s5] sm:$0xff] }
 0x441   :  { %v2085_v54 = vsel %vm38_vm0, %v2064_v17, 0 }
 0x442   :  { %v1520_v21 = vsub.f32 1.0, %v1519_v18  ;;  %v2038_v52 = vsub.s32 0, %v2029_v37  ;;  %v4005_v55 = vand.u32 4294901760, %v2085_v54 }
 0x444   :  { %v1521_v22 = vmul.f32 0.5, %v1520_v21  ;;  %v4008_v56 = vsub.f32 %v2085_v54, %v4005_v55 }
 0x446   :  { %1527 = vrot.lane.b32.xlu1 %v1521_v22, %s3395_s3  ;;  %v2167_v57 = vand.u32 4294901760, %v4008_v56 }
 0x448   :  { %v2168_v58 = vsub.f32 %v4008_v56, %v2167_v57 }
 0x44a   :  { %v2169_v59 = vand.u32 4294901760, %v2168_v58 }
 0x4b8   :  { %v1528_v23 = vpop.permute.xlu1 %1527 }
 0x4b9   :  { %v1530_v24 = vsel %vm1529_vm12, %v1528_v23, 0 }
 0x4ba   :  { %v1605_v26 = vand.u32 4294901760, %v1530_v24 }
 0x4bc   :  { %v1606_v27 = vsub.f32 %v1530_v24, %v1605_v26  ;;  %3207 = vmatmul.mubr.f32.vlgmr.msra.gmra.mxu1 %v1605_v26  ;;  %v2187_v24 = vand.u32 4294901760, %v4053_v5 }
 0x4bd   :  { %3221 = vmatpush3.msra.mxu1 %v1561_v0  ;;  %3228 = vmatprep.mubr.msk.f32.mxu1 %vm3393_vm6, %v3392_v16 }
 0x4be   :  { %v1607_v29 = vand.u32 4294901760, %v1606_v27  ;;  %3222 = vmatprep.subr.mxu1 %v3392_v16 }
 0x4bf   :  { %3223 = vmatpush3.msra.mxu1 %v3922_v62 }
 0x4c0   :  { %v1608_v31 = vsub.f32 %v1606_v27, %v1607_v29  ;;  %3224 = vmatprep.subr.mxu1 %v3392_v16 }
 0x4c1   :  { %3225 = vmatpush3.msra.mxu1 %v3924_v63 }
 0x4c2   :  { %v1609_v32 = vand.u32 4294901760, %v1608_v31  ;;  %3226 = vmatprep.subr.mxu1 %v3392_v16 }
 0x4c3   :  { %3227 = vmatpush3.msra.mxu1 %v1570_v19 }
 0x4c4   :  { %3229 = vmatmul.mubr.f32.vlgmr.msra.gmra.mxu1 %v1607_v29  ;;  %3242 = vmatprep.subr.mxu1 %v3392_v16 }
 0x4c5   :  { %3196 = vmatmul.mubr.f32.vlgmr.msra.gmra.mxu0 %v1609_v32  ;;  %3243 = vmatpush3.msra.mxu1 %v1561_v0  ;;  %v3365_v0 = vld [vmem:[%s4137_s0 + $0x18] sm:$0xff] }
 0x4c6   :  { %3210 = vmatpush3.msra.mxu0 %v3932_v6  ;;  %3244 = vmatprep.subr.mxu1 %v3392_v16 }
 0x4c7   :  { %3211 = vmatprep.subr.mxu0 %v3392_v16  ;;  %3245 = vmatpush3.msra.mxu1 %v3922_v62  ;;  %v3364_v62 = vld [vmem:[%s4137_s0 + $0x10] sm:$0xff] }
 0x4c8   :  { %3212 = vmatpush3.msra.mxu0 %v3927_v1  ;;  %3246 = vmatprep.subr.mxu1 %v3392_v16 }
 0x4c9   :  { %3213 = vmatprep.subr.mxu0 %v3392_v16  ;;  %3247 = vmatpush3.msra.mxu1 %v3924_v63 }
 0x4ca   :  { %3214 = vmatpush3.msra.mxu0 %v3930_v2  ;;  %3248 = vmatprep.subr.mxu1 %v3392_v16 }
 0x4cb   :  { %3215 = vmatprep.subr.mxu0 %v3392_v16  ;;  %3217 = vmatprep.mubr.msk.f32.mxu0 %vm3393_vm6, %v3392_v16 }
 0x4cc   :  { %3216 = vmatpush3.msra.mxu0 %v1662_v3  ;;  %3249 = vmatpush3.msra.mxu1 %v1570_v19  ;;  %v2094_v19 = vsel %vm38_vm0, %v2067_v20, 0  ;;  %v4048_v3 = vsub.f32 %v2088_v14, %v4042_v33 }
 0x4cd   :  { %3250 = vmatprep.mubr.msk.f32.mxu1 %vm3393_vm6, %v3392_v16  ;;  %3218 = vmatmul.mubr.f32.vlgmr.msra.gmra.mxu0 %v1606_v27 }
 0x4ce   :  { %3231 = vmatprep.subr.mxu0 %v3392_v16  ;;  %3251 = vmatmul.mubr.f32.vlgmr.msra.gmra.mxu1 %v1605_v26  ;;  %v2177_v18 = vand.u32 4294901760, %v4048_v3 }
 0x4cf   :  { %3232 = vmatpush3.msra.mxu0 %v1642_v10  ;;  %3239 = vmatprep.mubr.msk.f32.mxu0 %vm3393_vm6, %v3392_v16  ;;  %v3367_v10 = vld [vmem:[%s4137_s0 + $0x8] sm:$0xff] }
 0x4d0   :  { %3233 = vmatprep.subr.mxu0 %v3392_v16  ;;  %3275 = vmatprep.mubr.f32.mxu1 %v4005_v55  ;;  %v2178_v32 = vsub.f32 %v4048_v3, %v2177_v18 }
 0x4d1   :  { %3234 = vmatpush3.msra.mxu0 %v1649_v7  ;;  %v3366_v7 = vld [vmem:[%s4137_s0] sm:$0xff]  ;;  %s3397_s0 = smov [#allocation2]  }
 0x4d2   :  { %3235 = vmatprep.subr.mxu0 %v3392_v16  ;;  %s2735_s5 = sshll.u32 %s3397_s0, 4  ;;  %s2736_s5 = int_to_ptr.vmem [resolvable:$true] %s2735_s5 }
 0x4d3   :  { %3236 = vmatpush3.msra.mxu0 %v1656_v8  ;;  %s3368_s10 = scalar_lea.vmem %s2736_s5, 32  ;;  %p3373_p1 = scmp.lt.s32.totalorder %s2736_s5, %s2736_s5 }
 0x4d4   :  { %3237 = vmatprep.subr.mxu0 %v3392_v16  ;;  %v2030_v16 = vsub.s32 1, %v2029_v37  ;;  %p3369_p0 = scmp.ne.s32.totalorder %s2736_s5, %s3368_s10  ;;  %p3374_p2 = scmp.lt.s32.totalorder %s3368_s10, %s3368_s10 }
 0x4d5   :  { %3238 = vmatpush3.msra.mxu0 %v1663_v4  ;;  %v4050_v4 = vand.u32 4294901760, %v2094_v19 }
 0x4d6   :  { %3240 = vmatmul.mubr.f32.vlgmr.msra.gmra.mxu0 %v1605_v26  ;;  %p3375_p3 = por %p3374_p2, %p3373_p1 }
 0x4d7   :  { %3261 = vmatprep.mubr.f32.mxu0 %v2169_v59  ;;  %v4057_v21 = vsub.f32 %v2094_v19, %v4050_v4 }
 0x4d8   :  { %p3376_p4 = pnand %p3375_p3, %p3369_p0 }
 0x57c   :  { %v1702_v38 = vpop.f32.mrf.mxu1 }
 0x57e   :  { %v3208_v39 = vpop.f32.mrf.mxu1 }
 0x584   :  { %v1859_v40 = vpop.f32.mrf.mxu1 }
 0x585   :  { %v1611_v36 = vpop.f32.mrf.mxu0 }
 0x586   :  { %v3230_v41 = vpop.f32.mrf.mxu1  ;;  %v1703_v25 = vadd.f32 %v1702_v38, %v1611_v36  ;;  %v2197_v38 = vand.u32 4294901760, %v4057_v21 }
 0x587   :  { %v3197_v42 = vpop.f32.mrf.mxu0 }
 0x588   :  { %v2188_v42 = vsub.f32 %v4053_v5, %v2187_v24 }
 0x58d   :  { %v1782_v43 = vpop.f32.mrf.mxu0 }
 0x58e   :  { %v2017_v44 = vpop.f32.mrf.mxu1  ;;  %v1783_v28 = vadd.f32 %v1782_v43, %v1703_v25 }
 0x58f   :  { %v3219_v35 = vpop.f32.mrf.mxu0 }
 0x590   :  { %v3252_v45 = vpop.f32.mrf.mxu1  ;;  %v1860_v46 = vadd.f32 %v1859_v40, %v1783_v28 }
 0x591   :  { %v2179_v45 = vand.u32 4294901760, %v2178_v32 }
 0x596   :  { %v1942_v47 = vpop.f32.mrf.mxu0 }
 0x597   :  { %v1943_v48 = vadd.f32 %v1942_v47, %v1860_v46  ;;  %v2198_v46 = vsub.f32 %v4057_v21, %v2197_v38 }
 0x598   :  { %v3241_v49 = vpop.f32.mrf.mxu0 }
 0x599   :  { %v2018_v50 = vadd.f32 %v2017_v44, %v1943_v48 }
 0x59b   :  { %v2031_v51 = vrot.slane %v2018_v50, %v2030_v16  ;;  %2022 = vst.msk [vmem:[#allocation2] sm:$0x3] %vm2021_vm13, %v2018_v50  ;;  %v2039_v53 = vrot.slane %v2018_v50, %v2038_v52  ;;  %v2189_v16 = vand.u32 4294901760, %v2188_v42  ;;  %v2199_v52 = vand.u32 4294901760, %v2198_v46 }
 0x59d   :  { %2052 = vrot.lane.b32.xlu1 %v2031_v51, %s3396_s11  ;;  %2054 = vrot.lane.b32.xlu0 %v2031_v51, %s3396_s11 }
 0x5a1   :  { %2048 = vrot.lane.b32.xlu1 %v2039_v53, %s3396_s11  ;;  %2050 = vrot.lane.b32.xlu0 %v2039_v53, %s3396_s11 }
 0x60f   :  { %v2053_v60 = vpop.permute.xlu1 %2052  ;;  %v2055_v61 = vpop.permute.xlu0 %2054 }
 0x610   :  { %v2062_v63 = vmul.f32 %v3364_v62, %v2053_v60  ;;  %v2063_v1 = vmul.f32 %v3365_v0, %v2055_v61 }
 0x612   :  { %2076 = vrot.lane.b32.xlu1 %v2062_v63, %s3395_s3  ;;  %2078 = vrot.lane.b32.xlu0 %v2063_v1, %s3395_s3 }
 0x613   :  { %v2049_v2 = vpop.permute.xlu1 %2048  ;;  %v2051_v6 = vpop.permute.xlu0 %2050 }
 0x614   :  { %v2060_v8 = vmul.f32 %v3366_v7, %v2049_v2  ;;  %v2061_v12 = vmul.f32 %v3367_v10, %v2051_v6 }
 0x616   :  { %2072 = vrot.lane.b32.xlu1 %v2060_v8, %s3395_s3  ;;  %2074 = vrot.lane.b32.xlu0 %v2061_v12, %s3395_s3 }
 0x684   :  { %v2077_v9 = vpop.permute.xlu1 %2076  ;;  %v2079_v15 = vpop.permute.xlu0 %2078 }
 0x685   :  { %v4059_v22 = vand.u32 4294901760, %v2077_v9  ;;  %v4061_v23 = vand.u32 4294901760, %v2079_v15 }
 0x687   :  { %v2238_v26 = vsub.f32 %v2077_v9, %v4059_v22  ;;  %v2231_v27 = vsub.f32 %v2079_v15, %v4061_v23  ;;  %3253 = vmatprep.subr.mxu0 %v4061_v23 }
 0x688   :  { %v2073_v29 = vpop.permute.xlu1 %2072  ;;  %3254 = vmatpush3.msra.mxu0 %v4061_v23  ;;  %v2075_v31 = vpop.permute.xlu0 %2074 }
 0x689   :  { %v4072_v39 = vand.u32 4294901760, %v2073_v29  ;;  %v4074_v40 = vand.u32 4294901760, %v2075_v31  ;;  %3255 = vmatprep.subr.mxu0 %v4059_v22  ;;  %v2232_v36 = vand.u32 4294901760, %v2231_v27  ;;  %v2239_v41 = vand.u32 4294901760, %v2238_v26 }
 0x68a   :  { %3256 = vmatpush3.msra.mxu0 %v4059_v22 }
 0x68b   :  { %v2252_v43 = vsub.f32 %v2073_v29, %v4072_v39  ;;  %v2245_v44 = vsub.f32 %v2075_v31, %v4074_v40  ;;  %3257 = vmatprep.subr.mxu0 %v4074_v40  ;;  %v2233_v25 = vsub.f32 %v2231_v27, %v2232_v36  ;;  %v2240_v35 = vsub.f32 %v2238_v26, %v2239_v41 }
 0x68c   :  { %3258 = vmatpush3.msra.mxu0 %v4074_v40 }
 0x68d   :  { %3259 = vmatprep.subr.mxu0 %v4072_v39  ;;  %v2234_v28 = vand.u32 4294901760, %v2233_v25  ;;  %v2246_v37 = vand.u32 4294901760, %v2245_v44  ;;  %v2253_v47 = vand.u32 4294901760, %v2252_v43  ;;  %v2241_v48 = vand.u32 4294901760, %v2240_v35 }
 0x68e   :  { %3260 = vmatpush3.msra.mxu0 %v4072_v39 }
 0x68f   :  { %3267 = vmatprep.subr.mxu1 %v2234_v28  ;;  %3281 = vmatprep.subr.mxu0 %v2231_v27  ;;  %v2247_v49 = vsub.f32 %v2245_v44, %v2246_v37  ;;  %v2254_v50 = vsub.f32 %v2252_v43, %v2253_v47 }
 0x690   :  { %3262 = vmatmul.mubr.f32.vlgmr.msra.gmra.mxu0 %v2179_v45  ;;  %3268 = vmatpush3.msra.mxu1 %v2234_v28 }
 0x691   :  { %3282 = vmatpush3.msra.mxu0 %v2231_v27  ;;  %3269 = vmatprep.subr.mxu1 %v2241_v48  ;;  %v2248_v51 = vand.u32 4294901760, %v2247_v49  ;;  %v2255_v53 = vand.u32 4294901760, %v2254_v50 }
 0x692   :  { %3283 = vmatprep.subr.mxu0 %v2238_v26  ;;  %3270 = vmatpush3.msra.mxu1 %v2241_v48 }
 0x693   :  { %3284 = vmatpush3.msra.mxu0 %v2238_v26  ;;  %3264 = vmatprep.mubr.f32.mxu0 %v2189_v16 }
 0x694   :  { %3271 = vmatprep.subr.mxu1 %v2248_v51  ;;  %3285 = vmatprep.subr.mxu0 %v2245_v44 }
 0x695   :  { %3265 = vmatmul.mubr.f32.gmra.mxu0 %v2199_v52  ;;  %3272 = vmatpush3.msra.mxu1 %v2248_v51 }
 0x696   :  { %3286 = vmatpush3.msra.mxu0 %v2245_v44  ;;  %3273 = vmatprep.subr.mxu1 %v2255_v53 }
 0x697   :  { %3287 = vmatprep.subr.mxu0 %v2252_v43  ;;  %3274 = vmatpush3.msra.mxu1 %v2255_v53 }
 0x698   :  { %3288 = vmatpush3.msra.mxu0 %v2252_v43  ;;  %3276 = vmatmul.mubr.f32.vlgmr.msra.gmra.mxu1 %v4042_v33 }
 0x699   :  { %3289 = vmatprep.mubr.f32.mxu0 %v4008_v56  ;;  %3295 = vmatprep.subr.mxu1 %v4061_v23 }
 0x69a   :  { %3309 = vmatprep.subr.mxu0 %v2232_v36  ;;  %3290 = vmatmul.mubr.f32.vlgmr.msra.gmra.mxu0 %v4048_v3 }
 0x69b   :  { %3296 = vmatpush3.msra.mxu1 %v4061_v23  ;;  %3310 = vmatpush3.msra.mxu0 %v2232_v36 }
 0x69c   :  { %3297 = vmatprep.subr.mxu1 %v4059_v22  ;;  %3311 = vmatprep.subr.mxu0 %v2239_v41 }
 0x69d   :  { %3278 = vmatprep.mubr.f32.mxu1 %v4045_v34  ;;  %3298 = vmatpush3.msra.mxu1 %v4059_v22 }
 0x69e   :  { %3312 = vmatpush3.msra.mxu0 %v2239_v41  ;;  %3279 = vmatmul.mubr.f32.gmra.mxu1 %v4050_v4 }
 0x69f   :  { %3299 = vmatprep.subr.mxu1 %v4074_v40  ;;  %3313 = vmatprep.subr.mxu0 %v2246_v37 }
 0x6a0   :  { %3292 = vmatprep.mubr.f32.mxu0 %v4053_v5  ;;  %3300 = vmatpush3.msra.mxu1 %v4074_v40 }
 0x6a1   :  { %3314 = vmatpush3.msra.mxu0 %v2246_v37  ;;  %3301 = vmatprep.subr.mxu1 %v4072_v39 }
 0x6a2   :  { %3293 = vmatmul.mubr.f32.gmra.mxu0 %v4057_v21  ;;  %3315 = vmatprep.subr.mxu0 %v2253_v47 }
 0x6a3   :  { %3302 = vmatpush3.msra.mxu1 %v4072_v39  ;;  %3303 = vmatprep.mubr.f32.mxu1 %v2167_v57 }
 0x6a4   :  { %3316 = vmatpush3.msra.mxu0 %v2253_v47  ;;  %3304 = vmatmul.mubr.f32.vlgmr.msra.gmra.mxu1 %v2177_v18 }
 0x6a5   :  { %3323 = vmatprep.subr.mxu1 %v4061_v23  ;;  %3317 = vmatprep.mubr.f32.mxu0 %v4005_v55 }
 0x6a6   :  { %3324 = vmatpush3.msra.mxu1 %v4061_v23  ;;  %3318 = vmatmul.mubr.f32.vlgmr.msra.gmra.mxu0 %v4042_v33 }
 0x6a7   :  { %3325 = vmatprep.subr.mxu1 %v4059_v22  ;;  %3306 = vmatprep.mubr.f32.mxu1 %v2187_v24 }
 0x6a8   :  { %3326 = vmatpush3.msra.mxu1 %v4059_v22  ;;  %3320 = vmatprep.mubr.f32.mxu0 %v4045_v34 }
 0x6a9   :  { %3307 = vmatmul.mubr.f32.gmra.mxu1 %v2197_v38  ;;  %3327 = vmatprep.subr.mxu1 %v4074_v40 }
 0x6aa   :  { %3328 = vmatpush3.msra.mxu1 %v4074_v40  ;;  %3321 = vmatmul.mubr.f32.gmra.mxu0 %v4050_v4 }
 0x6ab   :  { %3329 = vmatprep.subr.mxu1 %v4072_v39  ;;  %3331 = vmatprep.mubr.f32.mxu1 %v4005_v55 }
 0x6ac   :  { %3330 = vmatpush3.msra.mxu1 %v4072_v39 }
 0x6ad   :  { %3332 = vmatmul.mubr.f32.vlgmr.msra.gmra.mxu1 %v4042_v33 }
 0x6ae   :  { %3334 = vmatprep.mubr.f32.mxu1 %v4045_v34 }
 0x6b1   :  { %3335 = vmatmul.mubr.f32.gmra.mxu1 %v4050_v4 }
 0x750   :  { %v3263_v17 = vpop.f32.mrf.mxu0 }
 0x752   :  { %v2171_v54 = vpop.f32.mrf.mxu0 }
 0x755   :  { %v3266_v56 = vpop.f32.mrf.mxu0 }
 0x757   :  { %v2191_v57 = vpop.f32.mrf.mxu0 }
 0x758   :  { %v3277_v58 = vpop.f32.mrf.mxu1 }
 0x759   :  { %v2299_v1 = vadd.f32 %v3277_v58, %v3263_v17 }
 0x75a   :  { %v2292_v59 = vpop.f32.mrf.mxu1  ;;  %v3291_v60 = vpop.f32.mrf.mxu0 }
 0x75b   :  { %v2293_v61 = vadd.f32 %v2292_v59, %v2171_v54  ;;  %v2398_v8 = vadd.f32 %v3291_v60, %v2299_v1 }
 0x75c   :  { %v2390_v62 = vpop.f32.mrf.mxu0 }
 0x75d   :  { %v2391_v63 = vadd.f32 %v2390_v62, %v2293_v61 }
 0x75e   :  { %v3280_v0 = vpop.f32.mrf.mxu1 }
 0x75f   :  { %v2311_v10 = vadd.f32 %v3280_v0, %v3266_v56 }
 0x760   :  { %v2304_v55 = vpop.f32.mrf.mxu1 }
 0x761   :  { %v2305_v14 = vadd.f32 %v2304_v55, %v2191_v57 }
 0x762   :  { %v3294_v2 = vpop.f32.mrf.mxu0 }
 0x763   :  { %v2412_v34 = vadd.f32 %v3294_v2, %v2311_v10 }
 0x764   :  { %v2404_v6 = vpop.f32.mrf.mxu0  ;;  %v3305_v7 = vpop.f32.mrf.mxu1 }
 0x765   :  { %v2497_v20 = vadd.f32 %v3305_v7, %v2398_v8 }
 0x766   :  { %v2488_v12 = vpop.f32.mrf.mxu1  ;;  %v3319_v11 = vpop.f32.mrf.mxu0 }
 0x767   :  { %v2489_v13 = vadd.f32 %v2488_v12, %v2391_v63 }
 0x768   :  { %v2595_v30 = vpop.f32.mrf.mxu0 }
 0x769   :  { %v3308_v33 = vpop.f32.mrf.mxu1  ;;  %v2596_v19 = vadd.f32 %v2595_v30, %v2489_v13 }
 0x76a   :  { %v3322_v4 = vpop.f32.mrf.mxu0 }
 0x76b   :  { %v2504_v3 = vpop.f32.mrf.mxu1 }
 0x76c   :  { %3379 = shalt.err (!%p3376_p4)
}
 0x76d   :  { %2738 = dma.vmem_to_hbm [thread:$0]  %s2736_s5, 32, %s4144_s7, [#allocation3]   ;;  %v2405_v5 = vadd.f32 %v2404_v6, %v2305_v14  ;;  %v2602_v9 = vadd.f32 %v3319_v11, %v2497_v20  ;;  %v2513_v15 = vadd.f32 %v3308_v33, %v2412_v34  ;;  %v3333_v18 = vpop.f32.mrf.mxu1  ;;  %v2607_v23 = vpop.f32.mrf.mxu0  ;;  %vm2724_vm14 = vcmask 785408  }
 0x76e   :  { %s3398_s12 = smov 32   ;;  %s3399_s13 = smov 96  }
 0x76f   :  { %v2505_v21 = vadd.f32 %v2504_v3, %v2405_v5  ;;  %v2695_v22 = vadd.f32 %v3333_v18, %v2602_v9  ;;  %v2688_v24 = vpop.f32.mrf.mxu1  ;;  %v2614_v26 = vadd.f32 %v3322_v4, %v2513_v15  ;;  %s3400_s7 = smov 64  }
 0x770   :  { %v2689_v27 = vadd.f32 %v2688_v24, %v2596_v19 }
 0x771   :  { %2711 = vrot.lane.b32.xlu0 %v2695_v22, %s3398_s12  ;;  %v3336_v29 = vpop.f32.mrf.mxu1  ;;  %v2608_v31 = vadd.f32 %v2607_v23, %v2505_v21 }
 0x772   :  { %v2707_v32 = vadd.f32 %v3336_v29, %v2614_v26 }
 0x773   :  { %v2700_v38 = vpop.f32.mrf.mxu1 }
 0x774   :  { %v2701_v39 = vadd.f32 %v2700_v38, %v2608_v31 }
 0x775   :  { %2719 = vrot.lane.b32.xlu0 %v2707_v32, %s3399_s13 }
 0x776   :  { %2715 = vrot.lane.b32.xlu1 %v2701_v39, %s3400_s7 }
 0x7e3   :  { %v2712_v40 = vpop.permute.xlu0 %2711 }
 0x7e4   :  { %v2722_v36 = vsel %vm38_vm0, %v2689_v27, %v2712_v40 }
 0x7e7   :  { %v2720_v42 = vpop.permute.xlu0 %2719 }
 0x7e8   :  { %v2716_v41 = vpop.permute.xlu1 %2715 }
 0x7e9   :  { %v2723_v43 = vsel %vm954_vm8, %v2722_v36, %v2716_v41 }
 0x7ea   :  { %v2725_v44 = vsel %vm2724_vm14, %v2723_v43, %v2720_v42 }
 0x7eb   :  { %2726 = vst [vmem:[%s4143_s6] sm:$0xff] %v2725_v44 }
 0x7ec   :  { %3388 = dma.done.wait [#allocation3], 32  }
 0x7ed   :  { %3389 = vsyncadd [#allocation3], 4294967264 }
 0x7ee   :  { %2744 = vsyncpa [#allocation3], 1 }

</bundles_post_ra>
